<compile_context>
chip_gen: v7x
topology: tpu7x:2x2x1
jax: 0.10.0
libtpu: 0.0.40
codegen_flags: <defaults>
</compile_context>

<pallas_src>
import functools

import jax
import jax.numpy as jnp
from jax.experimental import pallas as pl
from jax.experimental.pallas import tpu as pltpu


def _round_up(x, m):
    return (x + m - 1) // m * m


# ----------------------------------------------------------------------------
# Single fused kernel:
#   vision patch-embed + LN + GELU-MLP + residual
#   -> in-vreg concat([visual, text]) per batch element
#   -> decoder LN + GELU-MLP + residual (bf16 scratch, carried across vocab tiles)
#   -> LM head for the current vocab tile
# ----------------------------------------------------------------------------
def _fused_multimodal_kernel(
    nP, S_txt,                                        # static, bound via partial
    patches_ref, txt_ref,
    wp_ref, bp_ref, vg_ref, vbeta_ref, vw1_ref, vb1_ref, vw2_ref, vb2_ref,
    dg_ref, dbeta_ref, dw1_ref, db1_ref, dw2_ref, db2_ref,
    lmw_ref, lmb_ref,
    o_ref,
    dec_ref,
):
    Bb = patches_ref.shape[0] // nP
    S_total = nP + S_txt
    eps = 1e-5

    # Decoder-block activations are computed once per row block (vocab tile 0)
    # and kept VMEM-resident (bf16) across all LM-head vocab tiles.
    @pl.when(pl.program_id(1) == 0)
    def _compute_block():
        # ---- vision model: patch-embed matmul, M = Bb*nP, K padded to 128 ----
        h0 = jnp.dot(patches_ref[...], wp_ref[...],
                     preferred_element_type=jnp.float32) + bp_ref[...]
        mu = jnp.mean(h0, axis=-1, keepdims=True)
        var = jnp.mean(jnp.square(h0 - mu), axis=-1, keepdims=True)
        h = (h0 - mu) * jax.lax.rsqrt(var + eps) * vg_ref[...] + vbeta_ref[...]
        # TODO(synk): PyTorch nn.GELU defaults to exact erf; tanh approximation
        # is used here because erf lowering support in Mosaic is not guaranteed.
        h1 = jax.nn.gelu(
            jnp.dot(h.astype(jnp.bfloat16), vw1_ref[...],
                    preferred_element_type=jnp.float32) + vb1_ref[...],
            approximate=True)
        h2 = jnp.dot(h1.astype(jnp.bfloat16), vw2_ref[...],
                     preferred_element_type=jnp.float32) + vb2_ref[...]
        vis = h0 + h2                                     # f32 [Bb*nP, H]

        # ---- combined = concat([visual, text], dim=1), built in vregs ----
        # (no HBM materialization, no scratch write + reload round trip)
        pieces = []
        for k in range(Bb):
            pieces.append(vis[k * nP:(k + 1) * nP, :])
            pieces.append(txt_ref[k * S_txt:(k + 1) * S_txt, :].astype(jnp.float32))
        x = jnp.concatenate(pieces, axis=0)               # f32 [Bb*S_total, H]

        # ---- decoder block: LN + GELU MLP + residual, M = Bb*S_total ----
        mu = jnp.mean(x, axis=-1, keepdims=True)
        var = jnp.mean(jnp.square(x - mu), axis=-1, keepdims=True)
        hd = (x - mu) * jax.lax.rsqrt(var + eps) * dg_ref[...] + dbeta_ref[...]
        d1 = jax.nn.gelu(
            jnp.dot(hd.astype(jnp.bfloat16), dw1_ref[...],
                    preferred_element_type=jnp.float32) + db1_ref[...],
            approximate=True)
        d2 = jnp.dot(d1.astype(jnp.bfloat16), dw2_ref[...],
                     preferred_element_type=jnp.float32) + db2_ref[...]
        # Single scratch write, stored bf16 -> cast-free LM-head feed per tile.
        dec_ref[...] = (x + d2).astype(jnp.bfloat16)

    # ---- LM head for this vocab tile: bf16 x bf16 -> f32, lane-dense store ----
    o_ref[...] = (jnp.dot(dec_ref[...], lmw_ref[...],
                          preferred_element_type=jnp.float32)
                  + lmb_ref[...]).astype(o_ref.dtype)


# ----------------------------------------------------------------------------
# Glue: patch extraction (matches Conv2d(kernel=stride=p) input flattening)
# ----------------------------------------------------------------------------
def extract_patches_nchw(x, p):
    B, C, H, W = x.shape
    x = x.reshape(B, C, H // p, p, W // p, p)
    x = x.transpose(0, 2, 4, 1, 3, 5)  # B, H/p, W/p, C, p, p
    return x.reshape(B, (H // p) * (W // p), C * p * p)


# ----------------------------------------------------------------------------
# Parameters (deterministic synthetic init)
#   matmul weights / embedding table in bf16 (MXU feeds, halved HBM/VMEM);
#   LayerNorm params and biases stay f32 (VPU-side math).
# ----------------------------------------------------------------------------
def init_params(key, *, vocab, hidden, mlp, patch_dim):
    ks = jax.random.split(key, 8)
    s = 0.02
    f32, bf16 = jnp.float32, jnp.bfloat16
    rnd = lambda k, shp: (jax.random.normal(k, shp, f32) * s).astype(bf16)
    return {
        # text embedding table (decoder.get_input_embeddings())
        "emb": rnd(ks[0], (vocab, hidden)),
        # vision model: patch-embed conv + one transformer-MLP block
        "w_patch": rnd(ks[1], (patch_dim, hidden)),
        "b_patch": jnp.zeros((hidden,), f32),
        "v_gamma": jnp.ones((hidden,), f32),
        "v_beta": jnp.zeros((hidden,), f32),
        "v_w1": rnd(ks[2], (hidden, mlp)),
        "v_b1": jnp.zeros((mlp,), f32),
        "v_w2": rnd(ks[3], (mlp, hidden)),
        "v_b2": jnp.zeros((hidden,), f32),
        # decoder: one transformer-MLP block + LM head
        "d_gamma": jnp.ones((hidden,), f32),
        "d_beta": jnp.zeros((hidden,), f32),
        "d_w1": rnd(ks[4], (hidden, mlp)),
        "d_b1": jnp.zeros((mlp,), f32),
        "d_w2": rnd(ks[5], (mlp, hidden)),
        "d_b2": jnp.zeros((hidden,), f32),
        "lm_w": rnd(ks[6], (hidden, vocab)),
        "lm_b": jnp.zeros((vocab,), f32),
    }


# ----------------------------------------------------------------------------
# Forward pass
# ----------------------------------------------------------------------------
@functools.partial(jax.jit, static_argnames=("patch",))
def multimodal_forward(params, pixel_values, input_ids, *, patch=4):
    B = pixel_values.shape[0]
    hidden = params["d_gamma"].shape[0]
    mlp = params["d_w1"].shape[1]
    vocab = params["lm_w"].shape[1]

    # --- text embedding lookup (glue; plain JAX gather, bf16 table) ---
    inputs_embeds = params["emb"][input_ids]               # [B, S_txt, H] bf16
    S_txt = inputs_embeds.shape[1]

    # --- patch extraction (Conv2d(kernel=stride=p) flattening, glue) ---
    patches = extract_patches_nchw(pixel_values, patch)    # [B, nP, C*p*p]
    nP, Kp = patches.shape[1], patches.shape[2]
    S_total = nP + S_txt

    # Pad contraction K to a full 128-lane MXU feed (zero rows in w_patch keep
    # the matmul result unchanged).
    Kp_pad = _round_up(Kp, 128)
    w_patch = params["w_patch"]
    if Kp_pad != Kp:
        patches = jnp.pad(patches, ((0, 0), (0, 0), (0, Kp_pad - Kp)))
        w_patch = jnp.pad(w_patch, ((0, Kp_pad - Kp), (0, 0)))

    # Pad vocab to a 128 multiple; wide lane-dense vocab tiles (256/512).
    V_pad = _round_up(vocab, 128)
    lm_w = params["lm_w"]
    lm_b = params["lm_b"].reshape(1, vocab)
    if V_pad != vocab:
        lm_w = jnp.pad(lm_w, ((0, 0), (0, V_pad - vocab)))
        lm_b = jnp.pad(lm_b, ((0, 0), (0, V_pad - vocab)))
    if V_pad % 512 == 0:
        tn = 512
    elif V_pad % 256 == 0:
        tn = 256
    else:
        tn = 128

    # Block of batch rows per grid step: decoder/LM-head matmul M = Bb*S_total.
    # (For large B, B_pad//Bb >= 2 keeps v7x's two TensorCores busy.)
    Bb = min(8, B)
    B_pad = _round_up(B, Bb)
    if B_pad != B:
        patches = jnp.pad(patches, ((0, B_pad - B), (0, 0), (0, 0)))
        inputs_embeds = jnp.pad(inputs_embeds, ((0, B_pad - B), (0, 0), (0, 0)))

    # Flatten to lane-dense 2-D operands; a row block = Bb whole batch elements.
    patches2d = patches.reshape(B_pad * nP, Kp_pad).astype(jnp.bfloat16)
    txt2d = inputs_embeds.reshape(B_pad * S_txt, hidden).astype(jnp.bfloat16)

    grid = (B_pad // Bb, V_pad // tn)
    wspec = lambda shape: pl.BlockSpec(shape, lambda i, j: (0, 0))

    out2d = pl.pallas_call(
        functools.partial(_fused_multimodal_kernel, nP, S_txt),
        out_shape=jax.ShapeDtypeStruct((B_pad * S_total, V_pad), jnp.float32),
        grid=grid,
        in_specs=[
            pl.BlockSpec((Bb * nP, Kp_pad), lambda i, j: (i, 0)),
            pl.BlockSpec((Bb * S_txt, hidden), lambda i, j: (i, 0)),
            wspec((Kp_pad, hidden)),
            wspec((1, hidden)), wspec((1, hidden)), wspec((1, hidden)),
            wspec((hidden, mlp)), wspec((1, mlp)),
            wspec((mlp, hidden)), wspec((1, hidden)),
            wspec((1, hidden)), wspec((1, hidden)),
            wspec((hidden, mlp)), wspec((1, mlp)),
            wspec((mlp, hidden)), wspec((1, hidden)),
            pl.BlockSpec((hidden, tn), lambda i, j: (0, j)),
            pl.BlockSpec((1, tn), lambda i, j: (0, j)),
        ],
        out_specs=pl.BlockSpec((Bb * S_total, tn), lambda i, j: (i, j)),
        scratch_shapes=[pltpu.VMEM((Bb * S_total, hidden), jnp.bfloat16)],
        compiler_params=pltpu.CompilerParams(
            dimension_semantics=("parallel", "arbitrary"),
            vmem_limit_bytes=48 * 1024 * 1024,
        ),
    )(
        patches2d, txt2d,
        w_patch, params["b_patch"].reshape(1, hidden),
        params["v_gamma"].reshape(1, hidden), params["v_beta"].reshape(1, hidden),
        params["v_w1"], params["v_b1"].reshape(1, mlp),
        params["v_w2"], params["v_b2"].reshape(1, hidden),
        params["d_gamma"].reshape(1, hidden), params["d_beta"].reshape(1, hidden),
        params["d_w1"], params["d_b1"].reshape(1, mlp),
        params["d_w2"], params["d_b2"].reshape(1, hidden),
        lm_w, lm_b,
    )

    # Un-flatten and strip batch / vocab padding.
    return out2d.reshape(B_pad, S_total, V_pad)[:B, :, :vocab]


# TODO(synk): the HuggingFace isinstance() dispatch, PeftModel unwrapping,
# processor/tokenizer plumbing and attention/label/loss handling have no Pallas
# equivalent; only the generic embed + vision-encode + concat + decode path is
# implemented (and the "decoder" stand-in has no attention).

if __name__ == "__main__":
    B, C, Himg, Wimg = 2, 4, 16, 16
    patch = 4
    seq = 8
    # Lane-aligned synthetic model dims (multiples of 128) so all stores are
    # unmasked 128-lane-dense and MXU feeds are full-width.
    hidden = 128
    mlp = 256
    vocab = 256

    key = jax.random.PRNGKey(0)
    k_params, k_pix, k_ids = jax.random.split(key, 3)

    params = init_params(k_params, vocab=vocab, hidden=hidden, mlp=mlp,
                         patch_dim=C * patch * patch)
    pixel_values = jax.random.normal(k_pix, (B, C, Himg, Wimg), jnp.float32)
    input_ids = jax.random.randint(k_ids, (B, seq), 0, vocab, dtype=jnp.int32)

    logits = multimodal_forward(params, pixel_values, input_ids, patch=patch)
    jax.block_until_ready(logits)

    expected_seq = (Himg // patch) * (Wimg // patch) + seq
    assert logits.shape == (B, expected_seq, vocab), logits.shape
    assert bool(jnp.all(jnp.isfinite(logits)))
    print("KERNEL_OK")
</pallas_src>

<mosaic_0001>
module attributes {stable_mosaic.version = 11 : i64} {
  func.func @_fused_multimodal_kernel(%arg0: i32, %arg1: i32, %arg2: memref<32x128xbf16, #tpu.memory_space<vmem>>, %arg3: memref<16x128xbf16, #tpu.memory_space<vmem>>, %arg4: memref<128x128xbf16, #tpu.memory_space<vmem>>, %arg5: memref<1x128xf32, #tpu.memory_space<vmem>>, %arg6: memref<1x128xf32, #tpu.memory_space<vmem>>, %arg7: memref<1x128xf32, #tpu.memory_space<vmem>>, %arg8: memref<128x256xbf16, #tpu.memory_space<vmem>>, %arg9: memref<1x256xf32, #tpu.memory_space<vmem>>, %arg10: memref<256x128xbf16, #tpu.memory_space<vmem>>, %arg11: memref<1x128xf32, #tpu.memory_space<vmem>>, %arg12: memref<1x128xf32, #tpu.memory_space<vmem>>, %arg13: memref<1x128xf32, #tpu.memory_space<vmem>>, %arg14: memref<128x256xbf16, #tpu.memory_space<vmem>>, %arg15: memref<1x256xf32, #tpu.memory_space<vmem>>, %arg16: memref<256x128xbf16, #tpu.memory_space<vmem>>, %arg17: memref<1x128xf32, #tpu.memory_space<vmem>>, %arg18: memref<128x256xbf16, #tpu.memory_space<vmem>>, %arg19: memref<1x256xf32, #tpu.memory_space<vmem>>, %arg20: memref<48x256xf32, #tpu.memory_space<vmem>>, %arg21: memref<48x128xbf16, #tpu.memory_space<vmem>>) attributes {dimension_semantics = [#tpu.dimension_semantics<parallel>, #tpu.dimension_semantics<arbitrary>], iteration_bounds = array<i64: 1, 1>, scalar_prefetch = 0 : i64, scratch_operands = 1 : i64, tpu.core_type = #tpu.core_type<tc>, window_params = [{transform_indices = @transform_0, window_bounds = array<i64: 32, 128>}, {transform_indices = @transform_1, window_bounds = array<i64: 16, 128>}, {pipeline_mode = #tpu.pipeline_mode<synchronous>, transform_indices = @transform_2, window_bounds = array<i64: 128, 128>}, {pipeline_mode = #tpu.pipeline_mode<synchronous>, transform_indices = @transform_3, window_bounds = array<i64: 1, 128>}, {pipeline_mode = #tpu.pipeline_mode<synchronous>, transform_indices = @transform_4, window_bounds = array<i64: 1, 128>}, {pipeline_mode = #tpu.pipeline_mode<synchronous>, transform_indices = @transform_5, window_bounds = array<i64: 1, 128>}, {pipeline_mode = #tpu.pipeline_mode<synchronous>, transform_indices = @transform_6, window_bounds = array<i64: 128, 256>}, {pipeline_mode = #tpu.pipeline_mode<synchronous>, transform_indices = @transform_7, window_bounds = array<i64: 1, 256>}, {pipeline_mode = #tpu.pipeline_mode<synchronous>, transform_indices = @transform_8, window_bounds = array<i64: 256, 128>}, {pipeline_mode = #tpu.pipeline_mode<synchronous>, transform_indices = @transform_9, window_bounds = array<i64: 1, 128>}, {pipeline_mode = #tpu.pipeline_mode<synchronous>, transform_indices = @transform_10, window_bounds = array<i64: 1, 128>}, {pipeline_mode = #tpu.pipeline_mode<synchronous>, transform_indices = @transform_11, window_bounds = array<i64: 1, 128>}, {pipeline_mode = #tpu.pipeline_mode<synchronous>, transform_indices = @transform_12, window_bounds = array<i64: 128, 256>}, {pipeline_mode = #tpu.pipeline_mode<synchronous>, transform_indices = @transform_13, window_bounds = array<i64: 1, 256>}, {pipeline_mode = #tpu.pipeline_mode<synchronous>, transform_indices = @transform_14, window_bounds = array<i64: 256, 128>}, {pipeline_mode = #tpu.pipeline_mode<synchronous>, transform_indices = @transform_15, window_bounds = array<i64: 1, 128>}, {transform_indices = @transform_16, window_bounds = array<i64: 128, 256>}, {transform_indices = @transform_17, window_bounds = array<i64: 1, 256>}, {transform_indices = @transform_18, window_bounds = array<i64: 48, 256>}]} {
    %c0_i32 = arith.constant 0 : i32
    %0 = arith.cmpi eq, %arg1, %c0_i32 : i32
    %1 = arith.extui %0 : i1 to i32
    %c0_i32_0 = arith.constant 0 : i32
    %2 = arith.cmpi ne, %1, %c0_i32_0 : i32
    scf.if %2 {
      %c0_8 = arith.constant 0 : index
      %c0_9 = arith.constant 0 : index
      %10 = vector.load %arg2[%c0_8, %c0_9] : memref<32x128xbf16, #tpu.memory_space<vmem>>, vector<32x128xbf16>
      %c0_10 = arith.constant 0 : index
      %c0_11 = arith.constant 0 : index
      %11 = vector.load %arg4[%c0_10, %c0_11] : memref<128x128xbf16, #tpu.memory_space<vmem>>, vector<128x128xbf16>
      %cst_12 = arith.constant dense<0.000000e+00> : vector<32x128xf32>
      %12 = tpu.matmul %10, %11, %cst_12 {dimension_numbers = #tpu.dot_dimension_numbers<[1], [0], [0], [1], [0, 0, 1, 1], [], []>} : vector<32x128xbf16>, vector<128x128xbf16>, vector<32x128xf32> -> vector<32x128xf32>
      %c0_13 = arith.constant 0 : index
      %c0_14 = arith.constant 0 : index
      %13 = vector.load %arg5[%c0_13, %c0_14] : memref<1x128xf32, #tpu.memory_space<vmem>>, vector<1x128xf32>
      %14 = vector.broadcast %13 : vector<1x128xf32> to vector<32x128xf32>
      %15 = arith.addf %12, %14 : vector<32x128xf32>
      %cst_15 = arith.constant dense<0.000000e+00> : vector<32xf32>
      %16 = vector.multi_reduction <add>, %15, %cst_15 [1] : vector<32x128xf32> to vector<32xf32>
      %17 = vector.shape_cast %16 : vector<32xf32> to vector<32x1xf32>
      %cst_16 = arith.constant 1.280000e+02 : f32
      %18 = vector.broadcast %cst_16 : f32 to vector<32x1xf32>
      %19 = arith.divf %17, %18 : vector<32x1xf32>
      %20 = vector.broadcast %19 : vector<32x1xf32> to vector<32x128xf32>
      %21 = arith.subf %15, %20 : vector<32x128xf32>
      %22 = arith.mulf %21, %21 : vector<32x128xf32>
      %cst_17 = arith.constant dense<0.000000e+00> : vector<32xf32>
      %23 = vector.multi_reduction <add>, %22, %cst_17 [1] : vector<32x128xf32> to vector<32xf32>
      %24 = vector.shape_cast %23 : vector<32xf32> to vector<32x1xf32>
      %cst_18 = arith.constant 1.280000e+02 : f32
      %25 = vector.broadcast %cst_18 : f32 to vector<32x1xf32>
      %26 = arith.divf %24, %25 : vector<32x1xf32>
      %27 = vector.broadcast %19 : vector<32x1xf32> to vector<32x128xf32>
      %28 = arith.subf %15, %27 : vector<32x128xf32>
      %cst_19 = arith.constant 9.99999974E-6 : f32
      %29 = vector.broadcast %cst_19 : f32 to vector<32x1xf32>
      %30 = arith.addf %26, %29 : vector<32x1xf32>
      %31 = math.rsqrt %30 : vector<32x1xf32>
      %32 = vector.broadcast %31 : vector<32x1xf32> to vector<32x128xf32>
      %33 = arith.mulf %28, %32 : vector<32x128xf32>
      %c0_20 = arith.constant 0 : index
      %c0_21 = arith.constant 0 : index
      %34 = vector.load %arg6[%c0_20, %c0_21] : memref<1x128xf32, #tpu.memory_space<vmem>>, vector<1x128xf32>
      %35 = vector.broadcast %34 : vector<1x128xf32> to vector<32x128xf32>
      %36 = arith.mulf %33, %35 : vector<32x128xf32>
      %c0_22 = arith.constant 0 : index
      %c0_23 = arith.constant 0 : index
      %37 = vector.load %arg7[%c0_22, %c0_23] : memref<1x128xf32, #tpu.memory_space<vmem>>, vector<1x128xf32>
      %38 = vector.broadcast %37 : vector<1x128xf32> to vector<32x128xf32>
      %39 = arith.addf %36, %38 : vector<32x128xf32>
      %40 = arith.truncf %39 : vector<32x128xf32> to vector<32x128xbf16>
      %c0_24 = arith.constant 0 : index
      %c0_25 = arith.constant 0 : index
      %41 = vector.load %arg8[%c0_24, %c0_25] : memref<128x256xbf16, #tpu.memory_space<vmem>>, vector<128x256xbf16>
      %cst_26 = arith.constant dense<0.000000e+00> : vector<32x256xf32>
      %42 = tpu.matmul %40, %41, %cst_26 {dimension_numbers = #tpu.dot_dimension_numbers<[1], [0], [0], [1], [0, 0, 1, 1], [], []>} : vector<32x128xbf16>, vector<128x256xbf16>, vector<32x256xf32> -> vector<32x256xf32>
      %c0_27 = arith.constant 0 : index
      %c0_28 = arith.constant 0 : index
      %43 = vector.load %arg9[%c0_27, %c0_28] : memref<1x256xf32, #tpu.memory_space<vmem>>, vector<1x256xf32>
      %44 = vector.broadcast %43 : vector<1x256xf32> to vector<32x256xf32>
      %45 = arith.addf %42, %44 : vector<32x256xf32>
      %46 = arith.mulf %45, %45 : vector<32x256xf32>
      %47 = arith.mulf %45, %46 : vector<32x256xf32>
      %cst_29 = arith.constant 4.471500e-02 : f32
      %48 = vector.broadcast %cst_29 : f32 to vector<32x256xf32>
      %49 = arith.mulf %48, %47 : vector<32x256xf32>
      %50 = arith.addf %45, %49 : vector<32x256xf32>
      %cst_30 = arith.constant 0.797884583 : f32
      %51 = vector.broadcast %cst_30 : f32 to vector<32x256xf32>
      %52 = arith.mulf %51, %50 : vector<32x256xf32>
      %53 = math.tanh %52 : vector<32x256xf32>
      %cst_31 = arith.constant 1.000000e+00 : f32
      %54 = vector.broadcast %cst_31 : f32 to vector<32x256xf32>
      %55 = arith.addf %54, %53 : vector<32x256xf32>
      %cst_32 = arith.constant 5.000000e-01 : f32
      %56 = vector.broadcast %cst_32 : f32 to vector<32x256xf32>
      %57 = arith.mulf %56, %55 : vector<32x256xf32>
      %58 = arith.mulf %45, %57 : vector<32x256xf32>
      %59 = arith.truncf %58 : vector<32x256xf32> to vector<32x256xbf16>
      %c0_33 = arith.constant 0 : index
      %c0_34 = arith.constant 0 : index
      %60 = vector.load %arg10[%c0_33, %c0_34] : memref<256x128xbf16, #tpu.memory_space<vmem>>, vector<256x128xbf16>
      %cst_35 = arith.constant dense<0.000000e+00> : vector<32x128xf32>
      %61 = tpu.matmul %59, %60, %cst_35 {dimension_numbers = #tpu.dot_dimension_numbers<[1], [0], [0], [1], [0, 0, 1, 1], [], []>} : vector<32x256xbf16>, vector<256x128xbf16>, vector<32x128xf32> -> vector<32x128xf32>
      %c0_36 = arith.constant 0 : index
      %c0_37 = arith.constant 0 : index
      %62 = vector.load %arg11[%c0_36, %c0_37] : memref<1x128xf32, #tpu.memory_space<vmem>>, vector<1x128xf32>
      %63 = vector.broadcast %62 : vector<1x128xf32> to vector<32x128xf32>
      %64 = arith.addf %61, %63 : vector<32x128xf32>
      %65 = arith.addf %15, %64 : vector<32x128xf32>
      %66 = vector.extract_strided_slice %65 {offsets = [0, 0], sizes = [16, 128], strides = [1, 1]} : vector<32x128xf32> to vector<16x128xf32>
      %c0_38 = arith.constant 0 : index
      %c0_39 = arith.constant 0 : index
      %67 = vector.load %arg3[%c0_38, %c0_39] : memref<16x128xbf16, #tpu.memory_space<vmem>>, vector<8x128xbf16>
      %68 = arith.extf %67 : vector<8x128xbf16> to vector<8x128xf32>
      %69 = vector.extract_strided_slice %65 {offsets = [16, 0], sizes = [16, 128], strides = [1, 1]} : vector<32x128xf32> to vector<16x128xf32>
      %c8 = arith.constant 8 : index
      %c0_40 = arith.constant 0 : index
      %70 = vector.load %arg3[%c8, %c0_40] : memref<16x128xbf16, #tpu.memory_space<vmem>>, vector<8x128xbf16>
      %71 = arith.extf %70 : vector<8x128xbf16> to vector<8x128xf32>
      %72 = tpu.concatenate %66, %68, %69, %71 in 0 : vector<16x128xf32>, vector<8x128xf32>, vector<16x128xf32>, vector<8x128xf32> -> vector<48x128xf32>
      %cst_41 = arith.constant dense<0.000000e+00> : vector<48xf32>
      %73 = vector.multi_reduction <add>, %72, %cst_41 [1] : vector<48x128xf32> to vector<48xf32>
      %74 = vector.shape_cast %73 : vector<48xf32> to vector<48x1xf32>
      %cst_42 = arith.constant 1.280000e+02 : f32
      %75 = vector.broadcast %cst_42 : f32 to vector<48x1xf32>
      %76 = arith.divf %74, %75 : vector<48x1xf32>
      %77 = vector.broadcast %76 : vector<48x1xf32> to vector<48x128xf32>
      %78 = arith.subf %72, %77 : vector<48x128xf32>
      %79 = arith.mulf %78, %78 : vector<48x128xf32>
      %cst_43 = arith.constant dense<0.000000e+00> : vector<48xf32>
      %80 = vector.multi_reduction <add>, %79, %cst_43 [1] : vector<48x128xf32> to vector<48xf32>
      %81 = vector.shape_cast %80 : vector<48xf32> to vector<48x1xf32>
      %cst_44 = arith.constant 1.280000e+02 : f32
      %82 = vector.broadcast %cst_44 : f32 to vector<48x1xf32>
      %83 = arith.divf %81, %82 : vector<48x1xf32>
      %84 = vector.broadcast %76 : vector<48x1xf32> to vector<48x128xf32>
      %85 = arith.subf %72, %84 : vector<48x128xf32>
      %cst_45 = arith.constant 9.99999974E-6 : f32
      %86 = vector.broadcast %cst_45 : f32 to vector<48x1xf32>
      %87 = arith.addf %83, %86 : vector<48x1xf32>
      %88 = math.rsqrt %87 : vector<48x1xf32>
      %89 = vector.broadcast %88 : vector<48x1xf32> to vector<48x128xf32>
      %90 = arith.mulf %85, %89 : vector<48x128xf32>
      %c0_46 = arith.constant 0 : index
      %c0_47 = arith.constant 0 : index
      %91 = vector.load %arg12[%c0_46, %c0_47] : memref<1x128xf32, #tpu.memory_space<vmem>>, vector<1x128xf32>
      %92 = vector.broadcast %91 : vector<1x128xf32> to vector<48x128xf32>
      %93 = arith.mulf %90, %92 : vector<48x128xf32>
      %c0_48 = arith.constant 0 : index
      %c0_49 = arith.constant 0 : index
      %94 = vector.load %arg13[%c0_48, %c0_49] : memref<1x128xf32, #tpu.memory_space<vmem>>, vector<1x128xf32>
      %95 = vector.broadcast %94 : vector<1x128xf32> to vector<48x128xf32>
      %96 = arith.addf %93, %95 : vector<48x128xf32>
      %97 = arith.truncf %96 : vector<48x128xf32> to vector<48x128xbf16>
      %c0_50 = arith.constant 0 : index
      %c0_51 = arith.constant 0 : index
      %98 = vector.load %arg14[%c0_50, %c0_51] : memref<128x256xbf16, #tpu.memory_space<vmem>>, vector<128x256xbf16>
      %cst_52 = arith.constant dense<0.000000e+00> : vector<48x256xf32>
      %99 = tpu.matmul %97, %98, %cst_52 {dimension_numbers = #tpu.dot_dimension_numbers<[1], [0], [0], [1], [0, 0, 1, 1], [], []>} : vector<48x128xbf16>, vector<128x256xbf16>, vector<48x256xf32> -> vector<48x256xf32>
      %c0_53 = arith.constant 0 : index
      %c0_54 = arith.constant 0 : index
      %100 = vector.load %arg15[%c0_53, %c0_54] : memref<1x256xf32, #tpu.memory_space<vmem>>, vector<1x256xf32>
      %101 = vector.broadcast %100 : vector<1x256xf32> to vector<48x256xf32>
      %102 = arith.addf %99, %101 : vector<48x256xf32>
      %103 = arith.mulf %102, %102 : vector<48x256xf32>
      %104 = arith.mulf %102, %103 : vector<48x256xf32>
      %cst_55 = arith.constant 4.471500e-02 : f32
      %105 = vector.broadcast %cst_55 : f32 to vector<48x256xf32>
      %106 = arith.mulf %105, %104 : vector<48x256xf32>
      %107 = arith.addf %102, %106 : vector<48x256xf32>
      %cst_56 = arith.constant 0.797884583 : f32
      %108 = vector.broadcast %cst_56 : f32 to vector<48x256xf32>
      %109 = arith.mulf %108, %107 : vector<48x256xf32>
      %110 = math.tanh %109 : vector<48x256xf32>
      %cst_57 = arith.constant 1.000000e+00 : f32
      %111 = vector.broadcast %cst_57 : f32 to vector<48x256xf32>
      %112 = arith.addf %111, %110 : vector<48x256xf32>
      %cst_58 = arith.constant 5.000000e-01 : f32
      %113 = vector.broadcast %cst_58 : f32 to vector<48x256xf32>
      %114 = arith.mulf %113, %112 : vector<48x256xf32>
      %115 = arith.mulf %102, %114 : vector<48x256xf32>
      %116 = arith.truncf %115 : vector<48x256xf32> to vector<48x256xbf16>
      %c0_59 = arith.constant 0 : index
      %c0_60 = arith.constant 0 : index
      %117 = vector.load %arg16[%c0_59, %c0_60] : memref<256x128xbf16, #tpu.memory_space<vmem>>, vector<256x128xbf16>
      %cst_61 = arith.constant dense<0.000000e+00> : vector<48x128xf32>
      %118 = tpu.matmul %116, %117, %cst_61 {dimension_numbers = #tpu.dot_dimension_numbers<[1], [0], [0], [1], [0, 0, 1, 1], [], []>} : vector<48x256xbf16>, vector<256x128xbf16>, vector<48x128xf32> -> vector<48x128xf32>
      %c0_62 = arith.constant 0 : index
      %c0_63 = arith.constant 0 : index
      %119 = vector.load %arg17[%c0_62, %c0_63] : memref<1x128xf32, #tpu.memory_space<vmem>>, vector<1x128xf32>
      %120 = vector.broadcast %119 : vector<1x128xf32> to vector<48x128xf32>
      %121 = arith.addf %118, %120 : vector<48x128xf32>
      %122 = arith.addf %72, %121 : vector<48x128xf32>
      %123 = arith.truncf %122 : vector<48x128xf32> to vector<48x128xbf16>
      %c0_64 = arith.constant 0 : index
      %c0_65 = arith.constant 0 : index
      %124 = vector.load %arg21[%c0_64, %c0_65] : memref<48x128xbf16, #tpu.memory_space<vmem>>, vector<48x128xbf16>
      tpu.vector_store %arg21[%c0_64, %c0_65], %123 {strides = array<i32>} : memref<48x128xbf16, #tpu.memory_space<vmem>>, vector<48x128xbf16>,
    } else {
    }
    %c0 = arith.constant 0 : index
    %c0_1 = arith.constant 0 : index
    %3 = vector.load %arg21[%c0, %c0_1] : memref<48x128xbf16, #tpu.memory_space<vmem>>, vector<48x128xbf16>
    %c0_2 = arith.constant 0 : index
    %c0_3 = arith.constant 0 : index
    %4 = vector.load %arg18[%c0_2, %c0_3] : memref<128x256xbf16, #tpu.memory_space<vmem>>, vector<128x256xbf16>
    %cst = arith.constant dense<0.000000e+00> : vector<48x256xf32>
    %5 = tpu.matmul %3, %4, %cst {dimension_numbers = #tpu.dot_dimension_numbers<[1], [0], [0], [1], [0, 0, 1, 1], [], []>} : vector<48x128xbf16>, vector<128x256xbf16>, vector<48x256xf32> -> vector<48x256xf32>
    %c0_4 = arith.constant 0 : index
    %c0_5 = arith.constant 0 : index
    %6 = vector.load %arg19[%c0_4, %c0_5] : memref<1x256xf32, #tpu.memory_space<vmem>>, vector<1x256xf32>
    %7 = vector.broadcast %6 : vector<1x256xf32> to vector<48x256xf32>
    %8 = arith.addf %5, %7 : vector<48x256xf32>
    %c0_6 = arith.constant 0 : index
    %c0_7 = arith.constant 0 : index
    %9 = vector.load %arg20[%c0_6, %c0_7] : memref<48x256xf32, #tpu.memory_space<vmem>>, vector<48x256xf32>
    tpu.vector_store %arg20[%c0_6, %c0_7], %8 {strides = array<i32>} : memref<48x256xf32, #tpu.memory_space<vmem>>, vector<48x256xf32>,
    return
  }
  func.func @transform_0(%arg0: i32, %arg1: i32) -> (i32, i32) {
    %c0_i32 = arith.constant 0 : i32
    %c0_i32_0 = arith.constant 0 : i32
    return %arg0, %c0_i32 : i32, i32
  }
  func.func @transform_1(%arg0: i32, %arg1: i32) -> (i32, i32) {
    %c0_i32 = arith.constant 0 : i32
    %c0_i32_0 = arith.constant 0 : i32
    return %arg0, %c0_i32 : i32, i32
  }
  func.func @transform_2(%arg0: i32, %arg1: i32) -> (i32, i32) {
    %c0_i32 = arith.constant 0 : i32
    %c0_i32_0 = arith.constant 0 : i32
    %c0_i32_1 = arith.constant 0 : i32
    return %c0_i32, %c0_i32_0 : i32, i32
  }
  func.func @transform_3(%arg0: i32, %arg1: i32) -> (i32, i32) {
    %c0_i32 = arith.constant 0 : i32
    %c0_i32_0 = arith.constant 0 : i32
    %c0_i32_1 = arith.constant 0 : i32
    return %c0_i32, %c0_i32_0 : i32, i32
  }
  func.func @transform_4(%arg0: i32, %arg1: i32) -> (i32, i32) {
    %c0_i32 = arith.constant 0 : i32
    %c0_i32_0 = arith.constant 0 : i32
    %c0_i32_1 = arith.constant 0 : i32
    return %c0_i32, %c0_i32_0 : i32, i32
  }
  func.func @transform_5(%arg0: i32, %arg1: i32) -> (i32, i32) {
    %c0_i32 = arith.constant 0 : i32
    %c0_i32_0 = arith.constant 0 : i32
    %c0_i32_1 = arith.constant 0 : i32
    return %c0_i32, %c0_i32_0 : i32, i32
  }
  func.func @transform_6(%arg0: i32, %arg1: i32) -> (i32, i32) {
    %c0_i32 = arith.constant 0 : i32
    %c0_i32_0 = arith.constant 0 : i32
    %c0_i32_1 = arith.constant 0 : i32
    return %c0_i32, %c0_i32_0 : i32, i32
  }
  func.func @transform_7(%arg0: i32, %arg1: i32) -> (i32, i32) {
    %c0_i32 = arith.constant 0 : i32
    %c0_i32_0 = arith.constant 0 : i32
    %c0_i32_1 = arith.constant 0 : i32
    return %c0_i32, %c0_i32_0 : i32, i32
  }
  func.func @transform_8(%arg0: i32, %arg1: i32) -> (i32, i32) {
    %c0_i32 = arith.constant 0 : i32
    %c0_i32_0 = arith.constant 0 : i32
    %c0_i32_1 = arith.constant 0 : i32
    return %c0_i32, %c0_i32_0 : i32, i32
  }
  func.func @transform_9(%arg0: i32, %arg1: i32) -> (i32, i32) {
    %c0_i32 = arith.constant 0 : i32
    %c0_i32_0 = arith.constant 0 : i32
    %c0_i32_1 = arith.constant 0 : i32
    return %c0_i32, %c0_i32_0 : i32, i32
  }
  func.func @transform_10(%arg0: i32, %arg1: i32) -> (i32, i32) {
    %c0_i32 = arith.constant 0 : i32
    %c0_i32_0 = arith.constant 0 : i32
    %c0_i32_1 = arith.constant 0 : i32
    return %c0_i32, %c0_i32_0 : i32, i32
  }
  func.func @transform_11(%arg0: i32, %arg1: i32) -> (i32, i32) {
    %c0_i32 = arith.constant 0 : i32
    %c0_i32_0 = arith.constant 0 : i32
    %c0_i32_1 = arith.constant 0 : i32
    return %c0_i32, %c0_i32_0 : i32, i32
  }
  func.func @transform_12(%arg0: i32, %arg1: i32) -> (i32, i32) {
    %c0_i32 = arith.constant 0 : i32
    %c0_i32_0 = arith.constant 0 : i32
    %c0_i32_1 = arith.constant 0 : i32
    return %c0_i32, %c0_i32_0 : i32, i32
  }
  func.func @transform_13(%arg0: i32, %arg1: i32) -> (i32, i32) {
    %c0_i32 = arith.constant 0 : i32
    %c0_i32_0 = arith.constant 0 : i32
    %c0_i32_1 = arith.constant 0 : i32
    return %c0_i32, %c0_i32_0 : i32, i32
  }
  func.func @transform_14(%arg0: i32, %arg1: i32) -> (i32, i32) {
    %c0_i32 = arith.constant 0 : i32
    %c0_i32_0 = arith.constant 0 : i32
    %c0_i32_1 = arith.constant 0 : i32
    return %c0_i32, %c0_i32_0 : i32, i32
  }
  func.func @transform_15(%arg0: i32, %arg1: i32) -> (i32, i32) {
    %c0_i32 = arith.constant 0 : i32
    %c0_i32_0 = arith.constant 0 : i32
    %c0_i32_1 = arith.constant 0 : i32
    return %c0_i32, %c0_i32_0 : i32, i32
  }
  func.func @transform_16(%arg0: i32, %arg1: i32) -> (i32, i32) {
    %c0_i32 = arith.constant 0 : i32
    %c0_i32_0 = arith.constant 0 : i32
    return %c0_i32, %arg1 : i32, i32
  }
  func.func @transform_17(%arg0: i32, %arg1: i32) -> (i32, i32) {
    %c0_i32 = arith.constant 0 : i32
    %c0_i32_0 = arith.constant 0 : i32
    return %c0_i32, %arg1 : i32, i32
  }
  func.func @transform_18(%arg0: i32, %arg1: i32) -> (i32, i32) {
    %c0_i32 = arith.constant 0 : i32
    return %arg0, %arg1 : i32, i32
  }
}

</mosaic_0001>

<bundles_post_ra>
// kernel: multimodal_forward.1
= control target key start
LH: loop header
LB: loop body
LE: loop exit
PB: predicated region body
PF: predicated region fallthrough
CT: control target
= control target key end

     0   :  { %s2558_s0 = inlined_call_operand.vmem [shape: bf16[32,128], index: 0, kind: input, shape index: {}]   ;;  %s2559_s1 = inlined_call_operand.vmem [shape: bf16[16,128], index: 1, kind: input, shape index: {}]   ;;  %s2560_s2 = inlined_call_operand.vmem [shape: bf16[128,128], index: 2, kind: input, shape index: {}]   ;;  %s2561_s3 = inlined_call_operand.vmem [shape: f32[1,128], index: 3, kind: input, shape index: {}]   ;;  %s2562_s4 = inlined_call_operand.vmem [shape: f32[1,128], index: 4, kind: input, shape index: {}]   ;;  %s2563_s5 = inlined_call_operand.vmem [shape: f32[1,128], index: 5, kind: input, shape index: {}]   ;;  %s2564_s6 = inlined_call_operand.vmem [shape: bf16[128,256], index: 6, kind: input, shape index: {}]   ;;  %s2565_s7 = inlined_call_operand.vmem [shape: f32[1,256], index: 7, kind: input, shape index: {}]   ;;  %s2566_s8 = inlined_call_operand.vmem [shape: bf16[256,128], index: 8, kind: input, shape index: {}]   ;;  %s2567_s9 = inlined_call_operand.vmem [shape: f32[1,128], index: 9, kind: input, shape index: {}]   ;;  %s2568_s10 = inlined_call_operand.vmem [shape: f32[1,128], index: 10, kind: input, shape index: {}]   ;;  %s2569_s11 = inlined_call_operand.vmem [shape: f32[1,128], index: 11, kind: input, shape index: {}]   ;;  %s2570_s12 = inlined_call_operand.vmem [shape: bf16[128,256], index: 12, kind: input, shape index: {}]   ;;  %s2571_s13 = inlined_call_operand.vmem [shape: f32[1,256], index: 13, kind: input, shape index: {}]   ;;  %s2572_s14 = inlined_call_operand.vmem [shape: bf16[256,128], index: 14, kind: input, shape index: {}]   ;;  %s2573_s15 = inlined_call_operand.vmem [shape: f32[1,128], index: 15, kind: input, shape index: {}]   ;;  %s2574_s16 = inlined_call_operand.vmem [shape: bf16[128,256], index: 16, kind: input, shape index: {}]   ;;  %s2575_s17 = inlined_call_operand.vmem [shape: f32[1,256], index: 17, kind: input, shape index: {}]   ;;  %s2576_s18 = inlined_call_operand.hbm [shape: f32[48,256], index: 18, kind: output, shape index: {}]  }
   0x1   :  { %2579 = sst [smem:[#allocation6_spill]] %s2558_s0 }
   0x2   :  { %2580 = sst [smem:[#allocation7_spill]] %s2559_s1 }
   0x3   :  { %2581 = sst [smem:[#allocation8_spill]] %s2560_s2 }
   0x4   :  { %s2582_s29 = sld [smem:[#allocation8_spill]]  ;;  %s2583_s23 = sld [smem:[#allocation6_spill]] }
   0xa   :  { %v1682_v0 = vld [vmem:[%s2582_s29] sm:$0xff]   ;;  %v1683_v1 = vld [vmem:[%s2582_s29 + $0x8] sm:$0xff]   ;;  %v1684_v2 = vld [vmem:[%s2582_s29 + $0x10] sm:$0xff]  }
   0xb   :  { %1658 = vmatprep.subr.bf16.mxu0 %v1682_v0  ;;  %v1685_v3 = vld [vmem:[%s2582_s29 + $0x18] sm:$0xff]   ;;  %v1690_v4 = vld [vmem:[%s2583_s23] sm:$0xff]   ;;  %v1687_v6 = vld [vmem:[%s2582_s29 + $0x28] sm:$0xff]  }
   0xc   :  { %1659 = vmatpush3.bf16.msra.mxu0 %v1682_v0  ;;  %v1686_v5 = vld [vmem:[%s2582_s29 + $0x20] sm:$0xff]   ;;  %1674 = vmatprep.mubr.bf16.mxu0 %v1690_v4  ;;  %v1688_v7 = vld [vmem:[%s2582_s29 + $0x30] sm:$0xff]   ;;  %v1689_v8 = vld [vmem:[%s2582_s29 + $0x38] sm:$0xff]  }
   0xd   :  { %1660 = vmatprep.subr.bf16.mxu0 %v1683_v1  ;;  %v1691_v9 = vld [vmem:[%s2583_s23 + $0x8] sm:$0xff]  }
  0x10   :  { %1661 = vmatpush3.bf16.msra.mxu0 %v1683_v1 }
  0x11   :  { %1662 = vmatprep.subr.bf16.mxu0 %v1684_v2 }
  0x14   :  { %1663 = vmatpush3.bf16.msra.mxu0 %v1684_v2 }
  0x15   :  { %1664 = vmatprep.subr.bf16.mxu0 %v1685_v3 }
  0x18   :  { %1665 = vmatpush3.bf16.msra.mxu0 %v1685_v3 }
  0x19   :  { %1666 = vmatprep.subr.bf16.mxu0 %v1686_v5 }
  0x1c   :  { %1667 = vmatpush3.bf16.msra.mxu0 %v1686_v5 }
  0x1d   :  { %1668 = vmatprep.subr.bf16.mxu0 %v1687_v6 }
  0x20   :  { %1669 = vmatpush3.bf16.msra.mxu0 %v1687_v6 }
  0x21   :  { %1670 = vmatprep.subr.bf16.mxu0 %v1688_v7 }
  0x24   :  { %1671 = vmatpush3.bf16.msra.mxu0 %v1688_v7 }
  0x25   :  { %1672 = vmatprep.subr.bf16.mxu0 %v1689_v8 }
  0x28   :  { %1673 = vmatpush3.bf16.msra.mxu0 %v1689_v8 }
  0x2b   :  { %1675 = vmatmul.mubr.bf16.vlgmr.msra.gmra.mrb[0].mxu0 %v1691_v9 }
  0x2c   :  { %23 = vsyncpa [#allocation4], 0  ;;  %v1485_v10 = vld [vmem:[%s2561_s3] ss:$0 sm:$0xff]  ;;  %v1692_v19 = vld [vmem:[%s2564_s6 + $0x4] ss:$8 sps:$4 sm:$0xff]  }
  0x2d   :  { %v1694_v20 = vld [vmem:[%s2564_s6] ss:$8 sps:$4 sm:$0xff]   ;;  %v1695_v21 = vld [vmem:[%s2564_s6 + $0x14] ss:$8 sps:$4 sm:$0xff]   ;;  %378 = vmatprep.subr.bf16.mxu1 %v1692_v19  ;;  %v1697_v38 = vld [vmem:[%s2564_s6 + $0x10] ss:$8 sps:$4 sm:$0xff]  }
  0x2e   :  { %379 = vmatpush1.bf16.msra.mxu1 %v1694_v20  ;;  %v1698_v39 = vld [vmem:[%s2564_s6 + $0x24] ss:$8 sps:$4 sm:$0xff]   ;;  %v1700_v40 = vld [vmem:[%s2564_s6 + $0x20] ss:$8 sps:$4 sm:$0xff]   ;;  %v1701_v41 = vld [vmem:[%s2564_s6 + $0x34] ss:$8 sps:$4 sm:$0xff]  }
  0x2f   :  { %380 = vmatprep.subr.bf16.mxu1 %v1695_v21  ;;  %v1703_v42 = vld [vmem:[%s2564_s6 + $0x30] ss:$8 sps:$4 sm:$0xff]   ;;  %v1704_v43 = vld [vmem:[%s2564_s6 + $0x44] ss:$8 sps:$4 sm:$0xff]   ;;  %v1706_v44 = vld [vmem:[%s2564_s6 + $0x40] ss:$8 sps:$4 sm:$0xff]  }
  0x30   :  { %v1707_v45 = vld [vmem:[%s2564_s6 + $0x54] ss:$8 sps:$4 sm:$0xff]   ;;  %v1709_v46 = vld [vmem:[%s2564_s6 + $0x50] ss:$8 sps:$4 sm:$0xff]   ;;  %v1710_v47 = vld [vmem:[%s2564_s6 + $0x64] ss:$8 sps:$4 sm:$0xff]  }
  0x31   :  { %v1880_v48 = vmov 0   ;;  %v1712_v49 = vld [vmem:[%s2564_s6 + $0x60] ss:$8 sps:$4 sm:$0xff]   ;;  %v1713_v50 = vld [vmem:[%s2564_s6 + $0x74] ss:$8 sps:$4 sm:$0xff]   ;;  %s2584_s29 = sld [smem:[#allocation7_spill]] }
  0x32   :  { %381 = vmatpush1.bf16.msra.mxu1 %v1697_v38  ;;  %410 = vmatprep.mubr.bf16.mxu1 %v1880_v48  ;;  %v1715_v51 = vld [vmem:[%s2564_s6 + $0x70] ss:$8 sps:$4 sm:$0xff]   ;;  %v1496_v2 = vld [vmem:[%s2562_s4] ss:$0 sm:$0xff] }
  0x33   :  { %382 = vmatprep.subr.bf16.mxu1 %v1698_v39  ;;  %v1497_v7 = vld [vmem:[%s2563_s5] ss:$0 sm:$0xff]  ;;  %v1730_v38 = vld [vmem:[%s2566_s8 + $0x78] sm:$0xff]  }
  0x34   :  { %v1731_v39 = vld [vmem:[%s2566_s8 + $0x38] sm:$0xff]  }
  0x36   :  { %383 = vmatpush1.bf16.msra.mxu1 %v1700_v40  ;;  %v288_v40 = vlaneseq }
  0x37   :  { %384 = vmatprep.subr.bf16.mxu1 %v1701_v41 }
  0x38   :  { %v289_v41 = vshrl.u32 %v288_v40, 7 }
  0x3a   :  { %385 = vmatpush1.bf16.msra.mxu1 %v1703_v42  ;;  %v2143_v42 = vsub.s32 0, %v289_v41 }
  0x3b   :  { %386 = vmatprep.subr.bf16.mxu1 %v1704_v43  ;;  %v286_v43 = vld [vmem:[%s2565_s7] sm:$0x3] }
  0x3e   :  { %387 = vmatpush1.bf16.msra.mxu1 %v1706_v44  ;;  %v2148_v44 = vsub.s32 1, %v289_v41 }
  0x3f   :  { %388 = vmatprep.subr.bf16.mxu1 %v1707_v45  ;;  %v291_v45 = vrot.slane %v286_v43, %v2143_v42 }
  0x42   :  { %389 = vmatpush1.bf16.msra.mxu1 %v1709_v46  ;;  %v295_v46 = vrot.slane %v286_v43, %v2148_v44 }
  0x43   :  { %390 = vmatprep.subr.bf16.mxu1 %v1710_v47 }
  0x46   :  { %391 = vmatpush1.bf16.msra.mxu1 %v1712_v49 }
  0x47   :  { %392 = vmatprep.subr.bf16.mxu1 %v1713_v50 }
  0x4a   :  { %393 = vmatpush1.bf16.msra.mxu1 %v1715_v51 }
  0xfe   :  { %v1676_v11 = vpop.f32.mrb[0].mxu0 }
  0xff   :  { %v2012_v12 = vadd.f32 %v1676_v11, %v1485_v10  ;;  %v186_v13 = vpop.f32.mrb[1].mxu0 }
 0x100   :  { %v2014_v14 = vadd.f32 %v1485_v10, %v186_v13  ;;  %v1677_v15 = vpop.f32.mrb[2].mxu0 }
 0x101   :  { %205 = vadd.xlane.f32.xlu1 %v2012_v12  ;;  %v189_v16 = vpop.f32.mrb[3].mxu0  ;;  %v2018_v17 = vadd.f32 %v1677_v15, %v1485_v10 }
 0x102   :  { %201 = vadd.xlane.f32.xlu0 %v2014_v14  ;;  %v2020_v18 = vadd.f32 %v1485_v10, %v189_v16 }
 0x105   :  { %207 = vadd.xlane.f32.xlu1 %v2018_v17 }
 0x106   :  { %203 = vadd.xlane.f32.xlu0 %v2020_v18 }
 0x18e   :  { %v206_v22 = vpop.xlane.xlu1 %205 }
 0x18f   :  { %v202_v23 = vpop.xlane.xlu0 %201  ;;  %v212_v24 = vmul.f32 0.0078125, %v206_v22 }
 0x190   :  { %v210_v25 = vmul.f32 0.0078125, %v202_v23 }
 0x191   :  { %v2035_v29 = vsub.f32 %v2012_v12, %v212_v24  ;;  %v1716_v24 = vld [vmem:[%s2566_s8 + $0x40] sm:$0xff]  }
 0x192   :  { %v214_v26 = vsub.f32 %v2014_v14, %v210_v25  ;;  %v208_v27 = vpop.xlane.xlu1 %207  ;;  %v1717_v25 = vld [vmem:[%s2566_s8] sm:$0xff]   ;;  %1596 = vmatprep.subr.bf16.mxu0 %v1716_v24 }
 0x193   :  { %v204_v28 = vpop.xlane.xlu0 %203  ;;  %v213_v30 = vmul.f32 0.0078125, %v208_v27  ;;  %v220_v35 = vmul.f32 %v2035_v29, %v2035_v29  ;;  %1597 = vmatpush3.bf16.msra.mxu0 %v1717_v25  ;;  %v1719_v27 = vld [vmem:[%s2566_s8 + $0x8] sm:$0xff]  }
 0x194   :  { %v211_v31 = vmul.f32 0.0078125, %v204_v28  ;;  %v218_v32 = vmul.f32 %v214_v26, %v214_v26  ;;  %v1720_v28 = vld [vmem:[%s2566_s8 + $0x50] sm:$0xff]  }
 0x195   :  { %v2039_v34 = vsub.f32 %v2018_v17, %v213_v30  ;;  %v1722_v30 = vld [vmem:[%s2566_s8 + $0x58] sm:$0xff]  }
 0x196   :  { %v215_v33 = vsub.f32 %v2020_v18, %v211_v31  ;;  %222 = vadd.xlane.f32.xlu0 %v218_v32  ;;  %v1723_v31 = vld [vmem:[%s2566_s8 + $0x18] sm:$0xff]   ;;  %v1724_v32 = vld [vmem:[%s2566_s8 + $0x60] sm:$0xff]  }
 0x197   :  { %v221_v37 = vmul.f32 %v2039_v34, %v2039_v34 }
 0x198   :  { %v219_v36 = vmul.f32 %v215_v33, %v215_v33 }
 0x19a   :  { %226 = vadd.xlane.f32.xlu0 %v220_v35  ;;  %224 = vadd.xlane.f32.xlu1 %v219_v36  ;;  %v1727_v35 = vld [vmem:[%s2566_s8 + $0x28] sm:$0xff]   ;;  %v1728_v36 = vld [vmem:[%s2566_s8 + $0x70] sm:$0xff]  }
 0x19e   :  { %228 = vadd.xlane.f32.xlu1 %v221_v37  ;;  %v1729_v37 = vld [vmem:[%s2566_s8 + $0x30] sm:$0xff]  }
 0x223   :  { %v223_v52 = vpop.xlane.xlu0 %222 }
 0x224   :  { %v230_v53 = vmul.f32 0.0078125, %v223_v52 }
 0x226   :  { %v234_v54 = vadd.f32 1e-05, %v230_v53 }
 0x227   :  { %v225_v55 = vpop.xlane.xlu1 %224  ;;  %v227_v56 = vpop.xlane.xlu0 %226 }
 0x228   :  { %1796 = vrsqrt.f32 %v234_v54  ;;  %v231_v57 = vmul.f32 0.0078125, %v225_v55  ;;  %v232_v58 = vmul.f32 0.0078125, %v227_v56 }
 0x22a   :  { %v235_v59 = vadd.f32 1e-05, %v231_v57  ;;  %v236_v60 = vadd.f32 1e-05, %v232_v58 }
 0x22b   :  { %v229_v61 = vpop.xlane.xlu1 %228 }
 0x22c   :  { %1798 = vrsqrt.f32 %v235_v59  ;;  %v233_v62 = vmul.f32 0.0078125, %v229_v61 }
 0x22d   :  { %1800 = vrsqrt.f32 %v236_v60 }
 0x22e   :  { %v237_v63 = vadd.f32 1e-05, %v233_v62 }
 0x230   :  { %1802 = vrsqrt.f32 %v237_v63 }
 0x232   :  { %v1797_v0 = vpop.eup %1796 }
 0x233   :  { %v242_v1 = vmul.f32 %v1797_v0, %v214_v26  ;;  %v1718_v26 = vld [vmem:[%s2566_s8 + $0x48] sm:$0xff]  }
 0x234   :  { %1598 = vmatprep.subr.bf16.mxu0 %v1718_v26 }
 0x235   :  { %v253_v5 = vmul.f32 %v1496_v2, %v242_v1  ;;  %1599 = vmatpush3.bf16.msra.mxu0 %v1719_v27 }
 0x236   :  { %v1799_v3 = vpop.eup %1798  ;;  %1600 = vmatprep.subr.bf16.mxu0 %v1720_v28 }
 0x237   :  { %v243_v4 = vmul.f32 %v1799_v3, %v215_v33  ;;  %v1801_v6 = vpop.eup %1800  ;;  %v264_v10 = vadd.f32 %v1497_v7, %v253_v5  ;;  %v1725_v33 = vld [vmem:[%s2566_s8 + $0x20] sm:$0xff]  }
 0x238   :  { %v244_v13 = vmul.f32 %v1801_v6, %v2035_v29  ;;  %v1721_v29 = vld [vmem:[%s2566_s8 + $0x10] sm:$0xff]  }
 0x239   :  { %v254_v8 = vmul.f32 %v1496_v2, %v243_v4  ;;  %1601 = vmatpush3.bf16.msra.mxu0 %v1721_v29 }
 0x23a   :  { %v1803_v9 = vpop.eup %1802  ;;  %v255_v20 = vmul.f32 %v1496_v2, %v244_v13  ;;  %1602 = vmatprep.subr.bf16.mxu0 %v1722_v30 }
 0x23b   :  { %v265_v11 = vadd.f32 %v1497_v7, %v254_v8  ;;  %v245_v15 = vmul.f32 %v1803_v9, %v2039_v34  ;;  %v1726_v34 = vld [vmem:[%s2566_s8 + $0x68] sm:$0xff]  }
 0x23c   :  { %v266_v22 = vadd.f32 %v1497_v7, %v255_v20 }
 0x23d   :  { %v268_v16 = vpack.c.bf16 %v265_v11, %v264_v10  ;;  %v256_v19 = vmul.f32 %v1496_v2, %v245_v15  ;;  %1603 = vmatpush3.bf16.msra.mxu0 %v1723_v31 }
 0x23e   :  { %1604 = vmatprep.subr.bf16.mxu0 %v1724_v32 }
 0x23f   :  { %411 = vmatmul.mubr.bf16.vlgmr.msra.gmra.mrb[0].mxu1 %v268_v16  ;;  %v267_v21 = vadd.f32 %v1497_v7, %v256_v19 }
 0x240   :  { %420 = vmatprep.mubr.bf16.mxu1 %v1880_v48 }
 0x241   :  { %v269_v23 = vpack.c.bf16 %v267_v21, %v266_v22  ;;  %1605 = vmatpush3.bf16.msra.mxu0 %v1725_v33 }
 0x242   :  { %1606 = vmatprep.subr.bf16.mxu0 %v1726_v34 }
 0x245   :  { %1607 = vmatpush3.bf16.msra.mxu0 %v1727_v35 }
 0x246   :  { %1608 = vmatprep.subr.bf16.mxu0 %v1728_v36 }
 0x247   :  { %421 = vmatmul.mubr.bf16.gmra.mrb[4].mxu1 %v269_v23 }
 0x248   :  { %934 = vmatprep.mubr.bf16.mxu1 %v1880_v48 }
 0x249   :  { %1609 = vmatpush3.bf16.msra.mxu0 %v1729_v37 }
 0x24a   :  { %1610 = vmatprep.subr.bf16.mxu0 %v1730_v38 }
 0x24d   :  { %1611 = vmatpush3.bf16.msra.mxu0 %v1731_v39 }
 0x312   :  { %v412_v47 = vpop.f32.mrb[0].mxu1 }
 0x313   :  { %v2152_v49 = vadd.f32 %v412_v47, %v291_v45  ;;  %v414_v50 = vpop.f32.mrb[1].mxu1 }
 0x314   :  { %v2154_v51 = vadd.f32 %v414_v50, %v295_v46  ;;  %v416_v52 = vpop.f32.mrb[2].mxu1 }
 0x315   :  { %v431_v53 = vmul.f32 %v2152_v49, %v2152_v49  ;;  %v2158_v54 = vadd.f32 %v416_v52, %v291_v45  ;;  %v418_v55 = vpop.f32.mrb[3].mxu1 }
 0x316   :  { %v432_v56 = vmul.f32 %v2154_v51, %v2154_v51  ;;  %v2162_v57 = vadd.f32 %v418_v55, %v295_v46 }
 0x317   :  { %v439_v58 = vmul.f32 %v431_v53, %v2152_v49  ;;  %v433_v59 = vmul.f32 %v2158_v54, %v2158_v54 }
 0x318   :  { %v440_v60 = vmul.f32 %v432_v56, %v2154_v51  ;;  %v434_v61 = vmul.f32 %v2162_v57, %v2162_v57 }
 0x319   :  { %v447_v62 = vmul.f32 0.044715, %v439_v58  ;;  %v441_v63 = vmul.f32 %v433_v59, %v2158_v54 }
 0x31a   :  { %v448_v0 = vmul.f32 0.044715, %v440_v60  ;;  %v442_v1 = vmul.f32 %v434_v61, %v2162_v57  ;;  %v422_v2 = vpop.f32.mrb[4].mxu1 }
 0x31b   :  { %v455_v3 = vadd.f32 %v447_v62, %v2152_v49  ;;  %v449_v4 = vmul.f32 0.044715, %v441_v63  ;;  %v2173_v5 = vadd.f32 %v422_v2, %v291_v45  ;;  %v424_v6 = vpop.f32.mrb[5].mxu1 }
 0x31c   :  { %v456_v7 = vadd.f32 %v448_v0, %v2154_v51  ;;  %v450_v8 = vmul.f32 0.044715, %v442_v1  ;;  %v2176_v9 = vadd.f32 %v424_v6, %v295_v46  ;;  %v426_v10 = vpop.f32.mrb[6].mxu1 }
 0x31d   :  { %v463_v11 = vmul.f32 0.7978846, %v455_v3  ;;  %v457_v13 = vadd.f32 %v449_v4, %v2158_v54  ;;  %v435_v15 = vmul.f32 %v2173_v5, %v2173_v5  ;;  %v2181_v16 = vadd.f32 %v426_v10, %v291_v45  ;;  %v428_v19 = vpop.f32.mrb[7].mxu1 }
 0x31e   :  { %v464_v20 = vmul.f32 0.7978846, %v456_v7  ;;  %v458_v21 = vadd.f32 %v450_v8, %v2162_v57  ;;  %v436_v22 = vmul.f32 %v2176_v9, %v2176_v9  ;;  %v2186_v23 = vadd.f32 %v428_v19, %v295_v46 }
 0x31f   :  { %1804 = vtanh.f32 %v463_v11  ;;  %v465_v24 = vmul.f32 0.7978846, %v457_v13  ;;  %v443_v25 = vmul.f32 %v435_v15, %v2173_v5  ;;  %v437_v26 = vmul.f32 %v2181_v16, %v2181_v16 }
 0x320   :  { %1806 = vtanh.f32 %v464_v20  ;;  %v466_v27 = vmul.f32 0.7978846, %v458_v21  ;;  %v444_v28 = vmul.f32 %v436_v22, %v2176_v9  ;;  %v438_v29 = vmul.f32 %v2186_v23, %v2186_v23 }
 0x321   :  { %1808 = vtanh.f32 %v465_v24  ;;  %v451_v30 = vmul.f32 0.044715, %v443_v25  ;;  %v445_v31 = vmul.f32 %v437_v26, %v2181_v16 }
 0x322   :  { %1810 = vtanh.f32 %v466_v27  ;;  %v452_v32 = vmul.f32 0.044715, %v444_v28  ;;  %v446_v33 = vmul.f32 %v438_v29, %v2186_v23  ;;  %v1514_v28 = vld [vmem:[%s2567_s9] ss:$0 sm:$0xff] }
 0x323   :  { %v459_v34 = vadd.f32 %v451_v30, %v2173_v5  ;;  %v453_v35 = vmul.f32 0.044715, %v445_v31 }
 0x324   :  { %v460_v36 = vadd.f32 %v452_v32, %v2176_v9  ;;  %v454_v37 = vmul.f32 0.044715, %v446_v33 }
 0x325   :  { %v467_v38 = vmul.f32 0.7978846, %v459_v34  ;;  %v461_v39 = vadd.f32 %v453_v35, %v2181_v16 }
 0x326   :  { %v468_v40 = vmul.f32 0.7978846, %v460_v36  ;;  %v462_v41 = vadd.f32 %v454_v37, %v2186_v23 }
 0x327   :  { %1812 = vtanh.f32 %v467_v38  ;;  %v469_v43 = vmul.f32 0.7978846, %v461_v39 }
 0x328   :  { %1814 = vtanh.f32 %v468_v40  ;;  %v470_v45 = vmul.f32 0.7978846, %v462_v41 }
 0x329   :  { %v1805_v46 = vpop.eup %1804  ;;  %1816 = vtanh.f32 %v469_v43 }
 0x32a   :  { %v1807_v47 = vpop.eup %1806  ;;  %v479_v50 = vadd.f32 1.0, %v1805_v46  ;;  %1818 = vtanh.f32 %v470_v45 }
 0x32b   :  { %v1809_v52 = vpop.eup %1808  ;;  %v480_v53 = vadd.f32 1.0, %v1807_v47  ;;  %v1732_v47 = vld [vmem:[%s2570_s12] ss:$8 sps:$4 sm:$0xff]  }
 0x32c   :  { %v1811_v55 = vpop.eup %1810  ;;  %v487_v56 = vmul.f32 0.5, %v479_v50  ;;  %v481_v58 = vadd.f32 1.0, %v1809_v52  ;;  %v1737_v50 = vld [vmem:[%s2570_s12 + $0x14] ss:$8 sps:$4 sm:$0xff]  }
 0x32d   :  { %v482_v59 = vadd.f32 1.0, %v1811_v55  ;;  %v488_v60 = vmul.f32 0.5, %v480_v53 }
 0x32e   :  { %v489_v61 = vmul.f32 0.5, %v481_v58  ;;  %v495_v63 = vmul.f32 %v487_v56, %v2152_v49 }
 0x32f   :  { %v490_v62 = vmul.f32 0.5, %v482_v59  ;;  %v496_v2 = vmul.f32 %v488_v60, %v2154_v51 }
 0x330   :  { %v497_v0 = vmul.f32 %v489_v61, %v2158_v54 }
 0x331   :  { %v1813_v1 = vpop.eup %1812  ;;  %v498_v3 = vmul.f32 %v490_v62, %v2162_v57 }
 0x332   :  { %v1815_v4 = vpop.eup %1814  ;;  %v503_v6 = vpack.c.bf16 %v497_v0, %v495_v63  ;;  %v483_v7 = vadd.f32 1.0, %v1813_v1 }
 0x333   :  { %v1817_v8 = vpop.eup %1816  ;;  %v504_v10 = vpack.c.bf16 %v498_v3, %v496_v2  ;;  %v484_v11 = vadd.f32 1.0, %v1815_v4 }
 0x334   :  { %v1819_v13 = vpop.eup %1818  ;;  %v485_v15 = vadd.f32 1.0, %v1817_v8  ;;  %v491_v19 = vmul.f32 0.5, %v483_v7 }
 0x335   :  { %674 = vmatprep.mubr.bf16.mxu0 %v504_v10  ;;  %v486_v20 = vadd.f32 1.0, %v1819_v13  ;;  %v492_v21 = vmul.f32 0.5, %v484_v11 }
 0x336   :  { %675 = vmatmul.mubr.bf16.vlgmr.msra.gmra.mrb[4].mxu0 %v503_v6  ;;  %v493_v49 = vmul.f32 0.5, %v485_v15  ;;  %v499_v22 = vmul.f32 %v491_v19, %v2173_v5 }
 0x337   :  { %v494_v54 = vmul.f32 0.5, %v486_v20  ;;  %v500_v57 = vmul.f32 %v492_v21, %v2176_v9  ;;  %v1583_v9 = vld [vmem:[%s2584_s29] sm:$0xff]  }
 0x338   :  { %v501_v51 = vmul.f32 %v493_v49, %v2181_v16  ;;  %v2221_v36 = vunpack.c.l.bf16 %v1583_v9  ;;  %v2232_v46 = vunpack.c.h.bf16 %v1583_v9  ;;  %v1740_v21 = vld [vmem:[%s2570_s12 + $0x24] ss:$8 sps:$4 sm:$0xff]   ;;  %v1738_v49 = vld [vmem:[%s2570_s12 + $0x20] ss:$8 sps:$4 sm:$0xff]  }
 0x339   :  { %v502_v24 = vmul.f32 %v494_v54, %v2186_v23  ;;  %v1743_v54 = vld [vmem:[%s2570_s12 + $0x34] ss:$8 sps:$4 sm:$0xff]  }
 0x33a   :  { %v505_v25 = vpack.c.bf16 %v501_v51, %v499_v22  ;;  %v1741_v22 = vld [vmem:[%s2570_s12 + $0x30] ss:$8 sps:$4 sm:$0xff]   ;;  %v1746_v51 = vld [vmem:[%s2570_s12 + $0x44] ss:$8 sps:$4 sm:$0xff]  }
 0x33b   :  { %v506_v26 = vpack.c.bf16 %v502_v24, %v500_v57  ;;  %v1744_v57 = vld [vmem:[%s2570_s12 + $0x40] ss:$8 sps:$4 sm:$0xff]   ;;  %v1749_v24 = vld [vmem:[%s2570_s12 + $0x54] ss:$8 sps:$4 sm:$0xff]  }
 0x33d   :  { %682 = vmatprep.mubr.bf16.mxu0 %v506_v26  ;;  %v1752_v26 = vld [vmem:[%s2570_s12 + $0x64] ss:$8 sps:$4 sm:$0xff]  }
 0x33e   :  { %683 = vmatmul.mubr.bf16.gmra.mrb[8].mxu0 %v505_v25  ;;  %v1747_v25 = vld [vmem:[%s2570_s12 + $0x50] ss:$8 sps:$4 sm:$0xff]  }
 0x409   :  { %v1612_v27 = vpop.f32.mrb[4].mxu0 }
 0x40a   :  { %v1613_v29 = vpop.f32.mrb[5].mxu0 }
 0x40b   :  { %v1614_v30 = vadd.f32 %v1613_v29, %v1612_v27  ;;  %v1615_v31 = vpop.f32.mrb[6].mxu0  ;;  %v1750_v27 = vld [vmem:[%s2570_s12 + $0x60] ss:$8 sps:$4 sm:$0xff]   ;;  %v1755_v29 = vld [vmem:[%s2570_s12 + $0x74] ss:$8 sps:$4 sm:$0xff]  }
 0x40c   :  { %v1616_v32 = vpop.f32.mrb[7].mxu0 }
 0x40d   :  { %v677_v5 = vadd.f32 %v1614_v30, %v1514_v28  ;;  %v1617_v33 = vadd.f32 %v1616_v32, %v1615_v31 }
 0x40f   :  { %v680_v16 = vadd.f32 %v1617_v33, %v1514_v28  ;;  %v2215_v23 = vadd.f32 %v677_v5, %v2014_v14 }
 0x411   :  { %699 = vadd.xlane.f32.xlu0 %v2215_v23  ;;  %v1618_v34 = vpop.f32.mrb[8].mxu0  ;;  %v2219_v35 = vadd.f32 %v680_v16, %v2020_v18 }
 0x412   :  { %v1619_v37 = vpop.f32.mrb[9].mxu0 }
 0x413   :  { %v1620_v38 = vadd.f32 %v1619_v37, %v1618_v34  ;;  %701 = vadd.xlane.f32.xlu1 %v2219_v35  ;;  %v1621_v39 = vpop.f32.mrb[10].mxu0 }
 0x414   :  { %v1622_v40 = vpop.f32.mrb[11].mxu0 }
 0x415   :  { %v685_v41 = vadd.f32 %v1620_v38, %v1514_v28  ;;  %v1623_v43 = vadd.f32 %v1622_v40, %v1621_v39  ;;  %703 = vadd.xlane.f32.xlu0 %v2221_v36 }
 0x417   :  { %v688_v14 = vadd.f32 %v1623_v43, %v1514_v28  ;;  %v2226_v45 = vadd.f32 %v685_v41, %v2012_v12  ;;  %v1734_v12 = vld [vmem:[%s2570_s12 + $0x4] ss:$8 sps:$4 sm:$0xff]   ;;  %v1753_v28 = vld [vmem:[%s2570_s12 + $0x70] ss:$8 sps:$4 sm:$0xff]  }
 0x418   :  { %902 = vmatprep.subr.bf16.mxu1 %v1734_v12 }
 0x419   :  { %705 = vadd.xlane.f32.xlu1 %v2226_v45  ;;  %v2230_v18 = vadd.f32 %v688_v14, %v2018_v17  ;;  %903 = vmatpush1.bf16.msra.mxu1 %v1732_v47  ;;  %v1735_v17 = vld [vmem:[%s2570_s12 + $0x10] ss:$8 sps:$4 sm:$0xff]  }
 0x41a   :  { %904 = vmatprep.subr.bf16.mxu1 %v1737_v50 }
 0x41b   :  { %707 = vadd.xlane.f32.xlu0 %v2230_v18 }
 0x41d   :  { %709 = vadd.xlane.f32.xlu1 %v2232_v46  ;;  %905 = vmatpush1.bf16.msra.mxu1 %v1735_v17  ;;  %v1531_v17 = vld [vmem:[%s2568_s10] ss:$0 sm:$0xff] }
 0x41e   :  { %906 = vmatprep.subr.bf16.mxu1 %v1740_v21 }
 0x421   :  { %907 = vmatpush1.bf16.msra.mxu1 %v1738_v49 }
 0x422   :  { %908 = vmatprep.subr.bf16.mxu1 %v1743_v54 }
 0x425   :  { %909 = vmatpush1.bf16.msra.mxu1 %v1741_v22 }
 0x426   :  { %910 = vmatprep.subr.bf16.mxu1 %v1746_v51 }
 0x429   :  { %911 = vmatpush1.bf16.msra.mxu1 %v1744_v57 }
 0x42a   :  { %912 = vmatprep.subr.bf16.mxu1 %v1749_v24  ;;  %v1756_v24 = vld [vmem:[%s2572_s14 + $0x40] sm:$0xff]  }
 0x42b   :  { %1624 = vmatprep.subr.bf16.mxu0 %v1756_v24 }
 0x42d   :  { %913 = vmatpush1.bf16.msra.mxu1 %v1747_v25  ;;  %v1759_v25 = vld [vmem:[%s2572_s14 + $0x8] sm:$0xff]  }
 0x42e   :  { %914 = vmatprep.subr.bf16.mxu1 %v1752_v26  ;;  %v1760_v26 = vld [vmem:[%s2572_s14 + $0x50] sm:$0xff]  }
 0x431   :  { %915 = vmatpush1.bf16.msra.mxu1 %v1750_v27  ;;  %v1761_v27 = vld [vmem:[%s2572_s14 + $0x10] sm:$0xff]  }
 0x432   :  { %916 = vmatprep.subr.bf16.mxu1 %v1755_v29  ;;  %v1763_v29 = vld [vmem:[%s2572_s14 + $0x18] sm:$0xff]  }
 0x435   :  { %917 = vmatpush1.bf16.msra.mxu1 %v1753_v28  ;;  %v1762_v28 = vld [vmem:[%s2572_s14 + $0x58] sm:$0xff]  }
 0x49e   :  { %v700_v52 = vpop.xlane.xlu0 %699 }
 0x49f   :  { %v711_v53 = vmul.f32 0.0078125, %v700_v52 }
 0x4a0   :  { %v702_v55 = vpop.xlane.xlu1 %701 }
 0x4a1   :  { %v2249_v56 = vsub.f32 %v2215_v23, %v711_v53  ;;  %v712_v58 = vmul.f32 0.0078125, %v702_v55 }
 0x4a2   :  { %v704_v59 = vpop.xlane.xlu0 %703 }
 0x4a3   :  { %v2252_v60 = vsub.f32 %v2219_v35, %v712_v58  ;;  %v713_v61 = vmul.f32 0.0078125, %v704_v59  ;;  %v723_v62 = vmul.f32 %v2249_v56, %v2249_v56 }
 0x4a5   :  { %v2257_v63 = vsub.f32 %v2221_v36, %v713_v61  ;;  %729 = vadd.xlane.f32.xlu0 %v723_v62  ;;  %v724_v0 = vmul.f32 %v2252_v60, %v2252_v60  ;;  %v1532_v62 = vld [vmem:[%s2569_s11] ss:$0 sm:$0xff] }
 0x4a6   :  { %v706_v1 = vpop.xlane.xlu1 %705 }
 0x4a7   :  { %v714_v2 = vmul.f32 0.0078125, %v706_v1  ;;  %731 = vadd.xlane.f32.xlu1 %v724_v0  ;;  %v725_v3 = vmul.f32 %v2257_v63, %v2257_v63 }
 0x4a8   :  { %v708_v4 = vpop.xlane.xlu0 %707 }
 0x4a9   :  { %v2264_v6 = vsub.f32 %v2226_v45, %v714_v2  ;;  %v715_v7 = vmul.f32 0.0078125, %v708_v4  ;;  %733 = vadd.xlane.f32.xlu0 %v725_v3 }
 0x4aa   :  { %v710_v8 = vpop.xlane.xlu1 %709 }
 0x4ab   :  { %v2267_v10 = vsub.f32 %v2230_v18, %v715_v7  ;;  %v716_v11 = vmul.f32 0.0078125, %v710_v8  ;;  %v726_v13 = vmul.f32 %v2264_v6, %v2264_v6 }
 0x4ad   :  { %v2272_v15 = vsub.f32 %v2232_v46, %v716_v11  ;;  %735 = vadd.xlane.f32.xlu1 %v726_v13  ;;  %v727_v19 = vmul.f32 %v2267_v10, %v2267_v10 }
 0x4af   :  { %737 = vadd.xlane.f32.xlu0 %v727_v19  ;;  %v728_v20 = vmul.f32 %v2272_v15, %v2272_v15 }
 0x4b1   :  { %739 = vadd.xlane.f32.xlu1 %v728_v20 }
 0x532   :  { %v730_v30 = vpop.xlane.xlu0 %729 }
 0x533   :  { %v741_v31 = vmul.f32 0.0078125, %v730_v30  ;;  %v1764_v30 = vld [vmem:[%s2572_s14 + $0x60] sm:$0xff]  }
 0x534   :  { %v732_v32 = vpop.xlane.xlu1 %731 }
 0x535   :  { %v747_v5 = vadd.f32 1e-05, %v741_v31  ;;  %v742_v33 = vmul.f32 0.0078125, %v732_v32  ;;  %v1765_v31 = vld [vmem:[%s2572_s14 + $0x20] sm:$0xff]   ;;  %v1766_v32 = vld [vmem:[%s2572_s14 + $0x68] sm:$0xff]  }
 0x536   :  { %v734_v9 = vpop.xlane.xlu0 %733 }
 0x537   :  { %1820 = vrsqrt.f32 %v747_v5  ;;  %v748_v16 = vadd.f32 1e-05, %v742_v33  ;;  %v743_v34 = vmul.f32 0.0078125, %v734_v9  ;;  %v1767_v5 = vld [vmem:[%s2572_s14 + $0x28] sm:$0xff]   ;;  %v1768_v33 = vld [vmem:[%s2572_s14 + $0x70] sm:$0xff]  }
 0x538   :  { %v1769_v9 = vld [vmem:[%s2572_s14 + $0x30] sm:$0xff]  }
 0x539   :  { %1822 = vrsqrt.f32 %v748_v16  ;;  %v749_v37 = vadd.f32 1e-05, %v743_v34  ;;  %v1770_v16 = vld [vmem:[%s2572_s14 + $0x78] sm:$0xff]  }
 0x53a   :  { %v736_v38 = vpop.xlane.xlu1 %735  ;;  %v1771_v34 = vld [vmem:[%s2572_s14 + $0x38] sm:$0xff]  }
 0x53b   :  { %1824 = vrsqrt.f32 %v749_v37  ;;  %v744_v39 = vmul.f32 0.0078125, %v736_v38  ;;  %v1772_v37 = vld [vmem:[%s2574_s16] ss:$8 sps:$4 sm:$0xff]   ;;  %v1774_v38 = vld [vmem:[%s2574_s16 + $0x4] ss:$8 sps:$4 sm:$0xff]  }
 0x53c   :  { %v738_v40 = vpop.xlane.xlu0 %737  ;;  %1394 = vmatprep.subr.bf16.mxu1 %v1774_v38 }
 0x53d   :  { %v750_v41 = vadd.f32 1e-05, %v744_v39  ;;  %v745_v43 = vmul.f32 0.0078125, %v738_v40  ;;  %v1777_v39 = vld [vmem:[%s2574_s16 + $0x14] ss:$8 sps:$4 sm:$0xff]  }
 0x53e   :  { %v740_v14 = vpop.xlane.xlu1 %739  ;;  %v1775_v40 = vld [vmem:[%s2574_s16 + $0x10] ss:$8 sps:$4 sm:$0xff]  }
 0x53f   :  { %1826 = vrsqrt.f32 %v750_v41  ;;  %v751_v47 = vadd.f32 1e-05, %v745_v43  ;;  %v746_v12 = vmul.f32 0.0078125, %v740_v14  ;;  %v1780_v41 = vld [vmem:[%s2574_s16 + $0x24] ss:$8 sps:$4 sm:$0xff]  }
 0x540   :  { %v1778_v43 = vld [vmem:[%s2574_s16 + $0x20] ss:$8 sps:$4 sm:$0xff]   ;;  %v1783_v14 = vld [vmem:[%s2574_s16 + $0x34] ss:$8 sps:$4 sm:$0xff]  }
 0x541   :  { %v1821_v50 = vpop.eup %1820  ;;  %v752_v52 = vadd.f32 1e-05, %v746_v12  ;;  %1828 = vrsqrt.f32 %v751_v47  ;;  %v1781_v47 = vld [vmem:[%s2574_s16 + $0x30] ss:$8 sps:$4 sm:$0xff]   ;;  %v1786_v12 = vld [vmem:[%s2574_s16 + $0x44] ss:$8 sps:$4 sm:$0xff]  }
 0x542   :  { %v759_v53 = vmul.f32 %v1821_v50, %v2249_v56  ;;  %v1784_v50 = vld [vmem:[%s2574_s16 + $0x40] ss:$8 sps:$4 sm:$0xff]  }
 0x543   :  { %v1823_v55 = vpop.eup %1822  ;;  %1830 = vrsqrt.f32 %v752_v52 }
 0x544   :  { %v772_v58 = vmul.f32 %v1531_v17, %v759_v53  ;;  %v760_v59 = vmul.f32 %v1823_v55, %v2252_v60 }
 0x545   :  { %v1825_v61 = vpop.eup %1824 }
 0x546   :  { %v773_v0 = vmul.f32 %v1531_v17, %v760_v59  ;;  %v785_v1 = vadd.f32 %v1532_v62, %v772_v58  ;;  %v761_v3 = vmul.f32 %v1825_v61, %v2257_v63 }
 0x548   :  { %v786_v2 = vadd.f32 %v1532_v62, %v773_v0  ;;  %v774_v11 = vmul.f32 %v1531_v17, %v761_v3 }
 0x549   :  { %v1827_v4 = vpop.eup %1826 }
 0x54a   :  { %v791_v7 = vpack.c.bf16 %v786_v2, %v785_v1  ;;  %v762_v56 = vmul.f32 %v1827_v4, %v2264_v6  ;;  %v787_v21 = vadd.f32 %v1532_v62, %v774_v11 }
 0x54b   :  { %v1829_v8 = vpop.eup %1828 }
 0x54c   :  { %935 = vmatmul.mubr.bf16.vlgmr.msra.gmra.mrb[8].mxu1 %v791_v7  ;;  %v775_v13 = vmul.f32 %v1531_v17, %v762_v56  ;;  %v763_v49 = vmul.f32 %v1829_v8, %v2267_v10  ;;  %v1757_v10 = vld [vmem:[%s2572_s14] sm:$0xff]  }
 0x54d   :  { %v1831_v19 = vpop.eup %1830  ;;  %944 = vmatprep.mubr.bf16.mxu1 %v1880_v48  ;;  %1625 = vmatpush3.bf16.msra.mxu0 %v1757_v10 }
 0x54e   :  { %v788_v60 = vadd.f32 %v1532_v62, %v775_v13  ;;  %v764_v20 = vmul.f32 %v1831_v19, %v2272_v15  ;;  %v776_v63 = vmul.f32 %v1531_v17, %v763_v49  ;;  %v1758_v15 = vld [vmem:[%s2572_s14 + $0x48] sm:$0xff]   ;;  %1395 = vmatpush1.bf16.msra.mxu1 %v1772_v37 }
 0x54f   :  { %1626 = vmatprep.subr.bf16.mxu0 %v1758_v15  ;;  %1396 = vmatprep.subr.bf16.mxu1 %v1777_v39 }
 0x550   :  { %v792_v54 = vpack.c.bf16 %v788_v60, %v787_v21  ;;  %v777_v22 = vmul.f32 %v1531_v17, %v764_v20  ;;  %v789_v51 = vadd.f32 %v1532_v62, %v776_v63  ;;  %v810_v17 = vld [vmem:[%s2571_s13] sm:$0x3] }
 0x551   :  { %1627 = vmatpush3.bf16.msra.mxu0 %v1759_v25  ;;  %v2411_v52 = vrot.slane %v810_v17, %v2143_v42  ;;  %v2414_v53 = vrot.slane %v810_v17, %v2148_v44 }
 0x552   :  { %v790_v6 = vadd.f32 %v1532_v62, %v777_v22  ;;  %1628 = vmatprep.subr.bf16.mxu0 %v1760_v26  ;;  %1397 = vmatpush1.bf16.msra.mxu1 %v1775_v40 }
 0x553   :  { %1398 = vmatprep.subr.bf16.mxu1 %v1780_v41 }
 0x554   :  { %945 = vmatmul.mubr.bf16.gmra.mrb[12].mxu1 %v792_v54  ;;  %v793_v57 = vpack.c.bf16 %v790_v6, %v789_v51 }
 0x555   :  { %954 = vmatprep.mubr.bf16.mxu1 %v1880_v48  ;;  %1629 = vmatpush3.bf16.msra.mxu0 %v1761_v27 }
 0x556   :  { %1630 = vmatprep.subr.bf16.mxu0 %v1762_v28  ;;  %1399 = vmatpush1.bf16.msra.mxu1 %v1778_v43 }
 0x557   :  { %1400 = vmatprep.subr.bf16.mxu1 %v1783_v14 }
 0x559   :  { %1631 = vmatpush3.bf16.msra.mxu0 %v1763_v29 }
 0x55a   :  { %1632 = vmatprep.subr.bf16.mxu0 %v1764_v30  ;;  %1401 = vmatpush1.bf16.msra.mxu1 %v1781_v47 }
 0x55b   :  { %1402 = vmatprep.subr.bf16.mxu1 %v1786_v12 }
 0x55c   :  { %955 = vmatmul.mubr.bf16.gmra.mrb[16].mxu1 %v793_v57 }
 0x55d   :  { %1426 = vmatprep.mubr.bf16.mxu1 %v1880_v48  ;;  %1633 = vmatpush3.bf16.msra.mxu0 %v1765_v31 }
 0x55e   :  { %1634 = vmatprep.subr.bf16.mxu0 %v1766_v32  ;;  %1403 = vmatpush1.bf16.msra.mxu1 %v1784_v50 }
 0x561   :  { %1635 = vmatpush3.bf16.msra.mxu0 %v1767_v5 }
 0x562   :  { %1636 = vmatprep.subr.bf16.mxu0 %v1768_v33 }
 0x565   :  { %1637 = vmatpush3.bf16.msra.mxu0 %v1769_v9 }
 0x566   :  { %1638 = vmatprep.subr.bf16.mxu0 %v1770_v16 }
 0x569   :  { %1639 = vmatpush3.bf16.msra.mxu0 %v1771_v34 }
 0x61f   :  { %v936_v55 = vpop.f32.mrb[8].mxu1 }
 0x620   :  { %v2417_v58 = vadd.f32 %v936_v55, %v2411_v52  ;;  %v938_v59 = vpop.f32.mrb[9].mxu1 }
 0x621   :  { %v2420_v61 = vadd.f32 %v938_v59, %v2414_v53  ;;  %v940_v62 = vpop.f32.mrb[10].mxu1 }
 0x622   :  { %v965_v0 = vmul.f32 %v2417_v58, %v2417_v58  ;;  %v2425_v1 = vadd.f32 %v940_v62, %v2411_v52  ;;  %v942_v2 = vpop.f32.mrb[11].mxu1 }
 0x623   :  { %v966_v3 = vmul.f32 %v2420_v61, %v2420_v61  ;;  %v2430_v4 = vadd.f32 %v942_v2, %v2414_v53 }
 0x624   :  { %v977_v7 = vmul.f32 %v965_v0, %v2417_v58  ;;  %v967_v56 = vmul.f32 %v2425_v1, %v2425_v1 }
 0x625   :  { %v978_v8 = vmul.f32 %v966_v3, %v2420_v61  ;;  %v968_v11 = vmul.f32 %v2430_v4, %v2430_v4 }
 0x626   :  { %v989_v13 = vmul.f32 0.044715, %v977_v7  ;;  %v979_v19 = vmul.f32 %v967_v56, %v2425_v1 }
 0x627   :  { %v990_v60 = vmul.f32 0.044715, %v978_v8  ;;  %v980_v20 = vmul.f32 %v968_v11, %v2430_v4  ;;  %v946_v21 = vpop.f32.mrb[12].mxu1 }
 0x628   :  { %v1001_v49 = vadd.f32 %v989_v13, %v2417_v58  ;;  %v991_v54 = vmul.f32 0.044715, %v979_v19  ;;  %v2442_v22 = vadd.f32 %v946_v21, %v2411_v52  ;;  %v948_v63 = vpop.f32.mrb[13].mxu1 }
 0x629   :  { %v1002_v6 = vadd.f32 %v990_v60, %v2420_v61  ;;  %v992_v51 = vmul.f32 0.044715, %v980_v20  ;;  %v2446_v57 = vadd.f32 %v948_v63, %v2414_v53  ;;  %v950_v24 = vpop.f32.mrb[14].mxu1 }
 0x62a   :  { %v1013_v10 = vmul.f32 0.7978846, %v1001_v49  ;;  %v1003_v15 = vadd.f32 %v991_v54, %v2425_v1  ;;  %v969_v25 = vmul.f32 %v2442_v22, %v2442_v22  ;;  %v2452_v26 = vadd.f32 %v950_v24, %v2411_v52  ;;  %v952_v27 = vpop.f32.mrb[15].mxu1 }
 0x62b   :  { %v1014_v28 = vmul.f32 0.7978846, %v1002_v6  ;;  %v1004_v29 = vadd.f32 %v992_v51, %v2430_v4  ;;  %v970_v30 = vmul.f32 %v2446_v57, %v2446_v57  ;;  %v2458_v31 = vadd.f32 %v952_v27, %v2414_v53 }
 0x62c   :  { %1832 = vtanh.f32 %v1013_v10  ;;  %v1015_v32 = vmul.f32 0.7978846, %v1003_v15  ;;  %v981_v5 = vmul.f32 %v969_v25, %v2442_v22  ;;  %v971_v33 = vmul.f32 %v2452_v26, %v2452_v26 }
 0x62d   :  { %1834 = vtanh.f32 %v1014_v28  ;;  %v1016_v9 = vmul.f32 0.7978846, %v1004_v29  ;;  %v982_v16 = vmul.f32 %v970_v30, %v2446_v57  ;;  %v972_v34 = vmul.f32 %v2458_v31, %v2458_v31 }
 0x62e   :  { %1836 = vtanh.f32 %v1015_v32  ;;  %v993_v37 = vmul.f32 0.044715, %v981_v5  ;;  %v983_v38 = vmul.f32 %v971_v33, %v2452_v26 }
 0x62f   :  { %1838 = vtanh.f32 %v1016_v9  ;;  %v994_v39 = vmul.f32 0.044715, %v982_v16  ;;  %v984_v40 = vmul.f32 %v972_v34, %v2458_v31  ;;  %v956_v41 = vpop.f32.mrb[16].mxu1 }
 0x630   :  { %v1005_v43 = vadd.f32 %v993_v37, %v2442_v22  ;;  %v995_v14 = vmul.f32 0.044715, %v983_v38  ;;  %v2470_v47 = vadd.f32 %v956_v41, %v2411_v52  ;;  %v958_v12 = vpop.f32.mrb[17].mxu1 }
 0x631   :  { %v1006_v50 = vadd.f32 %v994_v39, %v2446_v57  ;;  %v996_v17 = vmul.f32 0.044715, %v984_v40  ;;  %v2474_v55 = vadd.f32 %v958_v12, %v2414_v53  ;;  %v960_v59 = vpop.f32.mrb[18].mxu1 }
 0x632   :  { %v1017_v62 = vmul.f32 0.7978846, %v1005_v43  ;;  %v1007_v0 = vadd.f32 %v995_v14, %v2452_v26  ;;  %v973_v2 = vmul.f32 %v2470_v47, %v2470_v47  ;;  %v2480_v3 = vadd.f32 %v960_v59, %v2411_v52  ;;  %v962_v7 = vpop.f32.mrb[19].mxu1 }
 0x633   :  { %v1018_v56 = vmul.f32 0.7978846, %v1006_v50  ;;  %v1008_v8 = vadd.f32 %v996_v17, %v2458_v31  ;;  %v974_v11 = vmul.f32 %v2474_v55, %v2474_v55  ;;  %v2486_v13 = vadd.f32 %v962_v7, %v2414_v53 }
 0x634   :  { %1840 = vtanh.f32 %v1017_v62  ;;  %v1019_v19 = vmul.f32 0.7978846, %v1007_v0  ;;  %v985_v60 = vmul.f32 %v973_v2, %v2470_v47  ;;  %v975_v20 = vmul.f32 %v2480_v3, %v2480_v3 }
 0x635   :  { %1842 = vtanh.f32 %v1018_v56  ;;  %v1020_v52 = vmul.f32 0.7978846, %v1008_v8  ;;  %v986_v21 = vmul.f32 %v974_v11, %v2474_v55  ;;  %v976_v49 = vmul.f32 %v2486_v13, %v2486_v13 }
 0x636   :  { %v1833_v54 = vpop.eup %1832  ;;  %1844 = vtanh.f32 %v1019_v19  ;;  %v997_v63 = vmul.f32 0.044715, %v985_v60  ;;  %v987_v53 = vmul.f32 %v975_v20, %v2480_v3 }
 0x637   :  { %v1835_v6 = vpop.eup %1834  ;;  %v1037_v51 = vadd.f32 1.0, %v1833_v54  ;;  %1846 = vtanh.f32 %v1020_v52  ;;  %v998_v24 = vmul.f32 0.044715, %v986_v21  ;;  %v988_v10 = vmul.f32 %v976_v49, %v2486_v13 }
 0x638   :  { %v1837_v15 = vpop.eup %1836  ;;  %v1009_v25 = vadd.f32 %v997_v63, %v2470_v47  ;;  %v999_v27 = vmul.f32 0.044715, %v987_v53  ;;  %v1038_v28 = vadd.f32 1.0, %v1835_v6 }
 0x639   :  { %v1839_v29 = vpop.eup %1838  ;;  %v1049_v30 = vmul.f32 0.5, %v1037_v51  ;;  %v1039_v32 = vadd.f32 1.0, %v1837_v15  ;;  %v1010_v5 = vadd.f32 %v998_v24, %v2474_v55  ;;  %v1000_v33 = vmul.f32 0.044715, %v988_v10 }
 0x63a   :  { %v1021_v9 = vmul.f32 0.7978846, %v1009_v25  ;;  %v1011_v16 = vadd.f32 %v999_v27, %v2480_v3  ;;  %v1040_v34 = vadd.f32 1.0, %v1839_v29  ;;  %v1050_v37 = vmul.f32 0.5, %v1038_v28 }
 0x63b   :  { %v1051_v38 = vmul.f32 0.5, %v1039_v32  ;;  %v1022_v39 = vmul.f32 0.7978846, %v1010_v5  ;;  %v1012_v40 = vadd.f32 %v1000_v33, %v2486_v13  ;;  %v1061_v14 = vmul.f32 %v1049_v30, %v2417_v58 }
 0x63c   :  { %1848 = vtanh.f32 %v1021_v9  ;;  %v1023_v41 = vmul.f32 0.7978846, %v1011_v16  ;;  %v1052_v43 = vmul.f32 0.5, %v1040_v34  ;;  %v1062_v59 = vmul.f32 %v1050_v37, %v2420_v61  ;;  %v1789_v16 = vld [vmem:[%s2574_s16 + $0x54] ss:$8 sps:$4 sm:$0xff]  }
 0x63d   :  { %v1063_v12 = vmul.f32 %v1051_v38, %v2425_v1  ;;  %1850 = vtanh.f32 %v1022_v39  ;;  %v1024_v50 = vmul.f32 0.7978846, %v1012_v40  ;;  %v1787_v34 = vld [vmem:[%s2574_s16 + $0x50] ss:$8 sps:$4 sm:$0xff]   ;;  %1404 = vmatprep.subr.bf16.mxu1 %v1789_v16  ;;  %v1549_v38 = vld [vmem:[%s2573_s15] ss:$0 sm:$0xff] }
 0x63e   :  { %v1841_v17 = vpop.eup %1840  ;;  %1852 = vtanh.f32 %v1023_v41  ;;  %v1064_v62 = vmul.f32 %v1052_v43, %v2430_v4  ;;  %1405 = vmatpush1.bf16.msra.mxu1 %v1787_v34 }
 0x63f   :  { %v1843_v0 = vpop.eup %1842  ;;  %v1073_v2 = vpack.c.bf16 %v1063_v12, %v1061_v14  ;;  %1854 = vtanh.f32 %v1024_v50  ;;  %v1041_v7 = vadd.f32 1.0, %v1841_v17 }
 0x640   :  { %v1845_v56 = vpop.eup %1844  ;;  %v1074_v8 = vpack.c.bf16 %v1064_v62, %v1062_v59  ;;  %v1042_v11 = vadd.f32 1.0, %v1843_v0 }
 0x641   :  { %v1847_v19 = vpop.eup %1846  ;;  %v1043_v60 = vadd.f32 1.0, %v1845_v56  ;;  %v1053_v58 = vmul.f32 0.5, %v1041_v7 }
 0x642   :  { %1246 = vmatprep.mubr.bf16.mxu0 %v1074_v8  ;;  %v1044_v1 = vadd.f32 1.0, %v1847_v19  ;;  %v1054_v20 = vmul.f32 0.5, %v1042_v11 }
 0x643   :  { %1247 = vmatmul.mubr.bf16.vlgmr.msra.gmra.mrb[12].mxu0 %v1073_v2  ;;  %v1055_v52 = vmul.f32 0.5, %v1043_v60  ;;  %v1065_v61 = vmul.f32 %v1053_v58, %v2442_v22 }
 0x644   :  { %v1056_v21 = vmul.f32 0.5, %v1044_v1  ;;  %v1066_v54 = vmul.f32 %v1054_v20, %v2446_v57 }
 0x645   :  { %v1067_v4 = vmul.f32 %v1055_v52, %v2452_v26 }
 0x646   :  { %v1849_v49 = vpop.eup %1848  ;;  %v1068_v63 = vmul.f32 %v1056_v21, %v2458_v31 }
 0x647   :  { %v1851_v53 = vpop.eup %1850  ;;  %v1075_v6 = vpack.c.bf16 %v1067_v4, %v1065_v61  ;;  %v1045_v51 = vadd.f32 1.0, %v1849_v49 }
 0x648   :  { %v1853_v24 = vpop.eup %1852  ;;  %v1076_v10 = vpack.c.bf16 %v1068_v63, %v1066_v54  ;;  %v1046_v15 = vadd.f32 1.0, %v1851_v53 }
 0x649   :  { %v1855_v25 = vpop.eup %1854  ;;  %v1047_v27 = vadd.f32 1.0, %v1853_v24  ;;  %v1057_v28 = vmul.f32 0.5, %v1045_v51 }
 0x64a   :  { %1254 = vmatprep.mubr.bf16.mxu0 %v1076_v10  ;;  %v1048_v29 = vadd.f32 1.0, %v1855_v25  ;;  %v1058_v30 = vmul.f32 0.5, %v1046_v15 }
 0x64b   :  { %1255 = vmatmul.mubr.bf16.gmra.mrb[16].mxu0 %v1075_v6  ;;  %v1059_v22 = vmul.f32 0.5, %v1047_v27  ;;  %v1069_v32 = vmul.f32 %v1057_v28, %v2470_v47  ;;  %v1792_v47 = vld [vmem:[%s2574_s16 + $0x64] ss:$8 sps:$4 sm:$0xff]  }
 0x64c   :  { %v1060_v26 = vmul.f32 0.5, %v1048_v29  ;;  %v1070_v31 = vmul.f32 %v1058_v30, %v2474_v55  ;;  %v1790_v55 = vld [vmem:[%s2574_s16 + $0x60] ss:$8 sps:$4 sm:$0xff]   ;;  %1406 = vmatprep.subr.bf16.mxu1 %v1792_v47 }
 0x64d   :  { %v1071_v57 = vmul.f32 %v1059_v22, %v2480_v3  ;;  %1407 = vmatpush1.bf16.msra.mxu1 %v1790_v55  ;;  %v1795_v3 = vld [vmem:[%s2574_s16 + $0x74] ss:$8 sps:$4 sm:$0xff]  }
 0x64e   :  { %v1072_v5 = vmul.f32 %v1060_v26, %v2486_v13  ;;  %v1793_v13 = vld [vmem:[%s2574_s16 + $0x70] ss:$8 sps:$4 sm:$0xff]   ;;  %1408 = vmatprep.subr.bf16.mxu1 %v1795_v3 }
 0x64f   :  { %v1077_v33 = vpack.c.bf16 %v1071_v57, %v1069_v32 }
 0x650   :  { %v1078_v9 = vpack.c.bf16 %v1072_v5, %v1070_v31 }
 0x651   :  { %1409 = vmatpush1.bf16.msra.mxu1 %v1793_v13 }
 0x652   :  { %1262 = vmatprep.mubr.bf16.mxu0 %v1078_v9 }
 0x653   :  { %1263 = vmatmul.mubr.bf16.gmra.mrb[20].mxu0 %v1077_v33 }
 0x716   :  { %v1640_v37 = vpop.f32.mrb[12].mxu0 }
 0x717   :  { %v1641_v39 = vpop.f32.mrb[13].mxu0 }
 0x718   :  { %v1642_v40 = vadd.f32 %v1641_v39, %v1640_v37  ;;  %v1643_v41 = vpop.f32.mrb[14].mxu0 }
 0x719   :  { %v1644_v43 = vpop.f32.mrb[15].mxu0 }
 0x71a   :  { %v1249_v14 = vadd.f32 %v1642_v40, %v1549_v38  ;;  %v1645_v12 = vadd.f32 %v1644_v43, %v1643_v41 }
 0x71c   :  { %v1252_v50 = vadd.f32 %v1645_v12, %v1549_v38  ;;  %v1271_v17 = vadd.f32 %v1249_v14, %v2215_v23 }
 0x71e   :  { %v1272_v59 = vadd.f32 %v1252_v50, %v2219_v35  ;;  %v1646_v62 = vpop.f32.mrb[16].mxu0 }
 0x71f   :  { %v1647_v0 = vpop.f32.mrb[17].mxu0 }
 0x720   :  { %v1277_v2 = vpack.c.bf16 %v1272_v59, %v1271_v17  ;;  %v1648_v7 = vadd.f32 %v1647_v0, %v1646_v62  ;;  %v1649_v56 = vpop.f32.mrb[18].mxu0 }
 0x721   :  { %v1650_v8 = vpop.f32.mrb[19].mxu0 }
 0x722   :  { %v1257_v11 = vadd.f32 %v1648_v7, %v1549_v38  ;;  %v1651_v19 = vadd.f32 %v1650_v8, %v1649_v56  ;;  %1427 = vmatmul.mubr.bf16.vlgmr.msra.gmra.mrb[20].mxu1 %v1277_v2 }
 0x723   :  { %1436 = vmatprep.mubr.bf16.mxu1 %v1880_v48 }
 0x724   :  { %v1260_v60 = vadd.f32 %v1651_v19, %v1549_v38  ;;  %v1273_v58 = vadd.f32 %v2221_v36, %v1257_v11  ;;  %v1302_v36 = vld [vmem:[%s2575_s17] sm:$0x3]  ;;  %s1881_s17 = smov [#allocation3]  }
 0x725   :  { %v1311_v51 = vrot.slane %v1302_v36, %v2148_v44  ;;  %s1474_s23 = sshll.u32 %s1881_s17, 4  ;;  %s1475_s23 = int_to_ptr.vmem [resolvable:$true] %s1474_s23 }
 0x726   :  { %v1274_v1 = vadd.f32 %v1260_v60, %v2226_v45  ;;  %v1652_v20 = vpop.f32.mrb[20].mxu0  ;;  %v1307_v45 = vrot.slane %v1302_v36, %v2143_v42  ;;  %s1856_s24 = scalar_lea.vmem %s1475_s23, 1536  ;;  %p1861_p1 = scmp.lt.s32.totalorder %s1475_s23, %s1475_s23 }
 0x727   :  { %v1653_v23 = vpop.f32.mrb[21].mxu0  ;;  %p1857_p0 = scmp.ne.s32.totalorder %s1475_s23, %s1856_s24  ;;  %p1862_p2 = scmp.lt.s32.totalorder %s1856_s24, %s1856_s24 }
 0x728   :  { %v1654_v52 = vadd.f32 %v1653_v23, %v1652_v20  ;;  %v1655_v35 = vpop.f32.mrb[22].mxu0  ;;  %v1278_v21 = vpack.c.bf16 %v1274_v1, %v1273_v58 }
 0x729   :  { %v1656_v61 = vpop.f32.mrb[23].mxu0  ;;  %p1863_p3 = por %p1862_p2, %p1861_p1 }
 0x72a   :  { %v1265_v4 = vadd.f32 %v1654_v52, %v1549_v38  ;;  %v1657_v49 = vadd.f32 %v1656_v61, %v1655_v35  ;;  %1437 = vmatmul.mubr.bf16.gmra.mrb[24].mxu1 %v1278_v21 }
 0x72b   :  { %1446 = vmatprep.mubr.bf16.mxu1 %v1880_v48  ;;  %p1864_p4 = pnand %p1863_p3, %p1857_p0 }
 0x72c   :  { %v1268_v54 = vadd.f32 %v1657_v49, %v1549_v38  ;;  %v1275_v63 = vadd.f32 %v1265_v4, %v2230_v18 }
 0x72e   :  { %v1276_v53 = vadd.f32 %v2232_v46, %v1268_v54 }
 0x730   :  { %v1279_v6 = vpack.c.bf16 %v1276_v53, %v1275_v63 }
 0x732   :  { %1447 = vmatmul.mubr.bf16.gmra.mrb[28].mxu1 %v1279_v6 }
 0x7f5   :  { %v1428_v24 = vpop.f32.mrb[20].mxu1 }
 0x7f6   :  { %v1429_v10 = vadd.f32 %v1428_v24, %v1307_v45  ;;  %v1430_v15 = vpop.f32.mrb[21].mxu1 }
 0x7f7   :  { %v1431_v25 = vadd.f32 %v1430_v15, %v1311_v51  ;;  %v1432_v48 = vpop.f32.mrb[22].mxu1 }
 0x7f8   :  { %1457 = vst [vmem:[#allocation3] sm:$0xff] %v1429_v10  ;;  %v1433_v27 = vadd.f32 %v1432_v48, %v1307_v45  ;;  %v1434_v18 = vpop.f32.mrb[23].mxu1 }
 0x7f9   :  { %1458 = vst [vmem:[#allocation3 + $0x8] sm:$0xff] %v1431_v25  ;;  %v1435_v46 = vadd.f32 %v1434_v18, %v1311_v51 }
 0x7fa   :  { %1459 = vst [vmem:[#allocation3 + $0x10] sm:$0xff] %v1433_v27 }
 0x7fb   :  { %1460 = vst [vmem:[#allocation3 + $0x18] sm:$0xff] %v1435_v46 }
 0x7fd   :  { %v1438_v28 = vpop.f32.mrb[24].mxu1 }
 0x7fe   :  { %v1439_v29 = vadd.f32 %v1438_v28, %v1307_v45  ;;  %v1440_v30 = vpop.f32.mrb[25].mxu1 }
 0x7ff   :  { %v1441_v22 = vadd.f32 %v1440_v30, %v1311_v51  ;;  %v1442_v26 = vpop.f32.mrb[26].mxu1 }
 0x800   :  { %1461 = vst [vmem:[#allocation3 + $0x20] sm:$0xff] %v1439_v29  ;;  %v1443_v42 = vadd.f32 %v1442_v26, %v1307_v45  ;;  %v1444_v44 = vpop.f32.mrb[27].mxu1 }
 0x801   :  { %1462 = vst [vmem:[#allocation3 + $0x28] sm:$0xff] %v1441_v22  ;;  %v1445_v32 = vadd.f32 %v1444_v44, %v1311_v51 }
 0x802   :  { %1463 = vst [vmem:[#allocation3 + $0x30] sm:$0xff] %v1443_v42 }
 0x803   :  { %1464 = vst [vmem:[#allocation3 + $0x38] sm:$0xff] %v1445_v32 }
 0x805   :  { %v1448_v57 = vpop.f32.mrb[28].mxu1 }
 0x806   :  { %v1449_v31 = vadd.f32 %v1448_v57, %v1307_v45  ;;  %v1450_v5 = vpop.f32.mrb[29].mxu1 }
 0x807   :  { %v1451_v33 = vadd.f32 %v1450_v5, %v1311_v51  ;;  %v1452_v9 = vpop.f32.mrb[30].mxu1 }
 0x808   :  { %1465 = vst [vmem:[#allocation3 + $0x40] sm:$0xff] %v1449_v31  ;;  %v1453_v16 = vadd.f32 %v1452_v9, %v1307_v45  ;;  %v1454_v34 = vpop.f32.mrb[31].mxu1 }
 0x809   :  { %1466 = vst [vmem:[#allocation3 + $0x48] sm:$0xff] %v1451_v33  ;;  %v1455_v47 = vadd.f32 %v1454_v34, %v1311_v51 }
 0x80a   :  { %1467 = vst [vmem:[#allocation3 + $0x50] sm:$0xff] %v1453_v16 }
 0x80b   :  { %1468 = vst [vmem:[#allocation3 + $0x58] sm:$0xff] %v1455_v47 }
 0x80c   :  { %1867 = shalt.err (!%p1864_p4)
}
 0x80d   :  { %s1868_s27 = scalar_lea.hbm %s2576_s18, 1536 }
 0x80e   :  { %p1869_p5 = scmp.ne.s32.totalorder %s2576_s18, %s1868_s27  ;;  %p1872_p6 = scmp.lt.u32.totalorder %s1868_s27, %s2576_s18 }
 0x810   :  { %p1874_p7 = pnand %p1872_p6, %p1869_p5 }
 0x812   :  { %1877 = shalt.err (!%p1874_p7)
}
 0x813   :  { %s1882_s19 = smov 256   ;;  %s1883_s10 = smov 16  }
 0x814   :  { %1480 = dma.vmem_to_hbm [thread:$0]  %s1475_s23, 1536, %s2576_s18, [#allocation4], %s1882_s19, %s1882_s19, %s1883_s10  }
 0x815   :  { %1878 = dma.done.wait [#allocation4], 1536  }
 0x816   :  { %1879 = vsyncadd [#allocation4], 4294965760 }
 0x817   :  { %1484 = vsyncpa [#allocation4], 1 }

</bundles_post_ra>
